<compile_context>
chip_gen: v5e
topology: v5e:2x2
jax: 0.10.0
libtpu: 0.0.40
codegen_flags: <defaults>
</compile_context>

<pallas_src>
import functools

import jax
import jax.numpy as jnp
from jax.experimental import pallas as pl
from jax.experimental.pallas import tpu as pltpu


def _sigmoid(v):
    # tanh-based logistic: one EUP op instead of exp + reciprocal.
    return 0.5 * jnp.tanh(0.5 * v) + 0.5


# ---------------------------------------------------------------------------
# Phase 1: hoisted input projection  gi = x @ W_ih + b  (batched over T*B).
# ---------------------------------------------------------------------------


def _proj_kernel(x_ref, w_ref, b_ref, o_ref):
    # x_ref: (T*B, D_in) bf16, w_ref: (1, D_in, G) bf16, b_ref: (1, 1, G) f32
    o_ref[0] = (
        jnp.dot(x_ref[...], w_ref[0], preferred_element_type=jnp.float32)
        + b_ref[0]
    )


# ---------------------------------------------------------------------------
# Phase 2: the recurrence.  One grid step == TCHUNK timesteps of one direction.
# ---------------------------------------------------------------------------


def _lstm_rec_kernel(gi_ref, w_hh_ref, o_ref, hb_ref, c_ref, *, hidden, tchunk):
    d = pl.program_id(0)          # direction: 0 = forward, 1 = backward
    tc = pl.program_id(1)         # time chunk (in processing order)
    H = hidden
    bwd = d == 1

    @pl.when(tc == 0)
    def _():
        hb_ref[...] = jnp.zeros_like(hb_ref)
        c_ref[...] = jnp.zeros_like(c_ref)

    w_hh = w_hh_ref[0]            # (H, 4H) bf16, VMEM resident
    hb = hb_ref[...]              # (B, H) bf16 shadow of h (matmul operand)
    c = c_ref[...]                # (B, H) f32

    outs = []
    for i in range(tchunk):       # fully unrolled in-chunk recurrence
        # Processing order: forward reads row i, backward reads row tchunk-1-i.
        g_f = gi_ref[0, i]
        g_b = gi_ref[0, tchunk - 1 - i]
        gi = jnp.where(bwd, g_b, g_f)                     # (B, 4H) f32 (has b)
        gates = gi + jnp.dot(hb, w_hh, preferred_element_type=jnp.float32)
        i_g = _sigmoid(gates[:, 0:H])
        f_g = _sigmoid(gates[:, H:2 * H])
        g_g = jnp.tanh(gates[:, 2 * H:3 * H])
        o_g = _sigmoid(gates[:, 3 * H:4 * H])
        c = f_g * c + i_g * g_g
        h = o_g * jnp.tanh(c)
        hb = h.astype(jnp.bfloat16)
        outs.append(h)

    hb_ref[...] = hb
    c_ref[...] = c
    # Un-reverse the backward direction inside the block, then one dense store.
    out_f = jnp.stack(outs, axis=0)
    out_b = jnp.stack(outs[::-1], axis=0)
    o_ref[...] = jnp.where(bwd, out_b, out_f).astype(o_ref.dtype)


def _gru_rec_kernel(gi_ref, w_hh_ref, b_hh_ref, o_ref, h_ref, hb_ref, *,
                    hidden, tchunk):
    d = pl.program_id(0)
    tc = pl.program_id(1)
    H = hidden
    bwd = d == 1

    @pl.when(tc == 0)
    def _():
        h_ref[...] = jnp.zeros_like(h_ref)
        hb_ref[...] = jnp.zeros_like(hb_ref)

    w_hh = w_hh_ref[0]            # (H, 3H) bf16
    b_hh = b_hh_ref[0]            # (1, 3H) f32
    h = h_ref[...]                # (B, H) f32
    hb = hb_ref[...]              # (B, H) bf16 shadow

    outs = []
    for i in range(tchunk):
        g_f = gi_ref[0, i]
        g_b = gi_ref[0, tchunk - 1 - i]
        gi = jnp.where(bwd, g_b, g_f)                     # (B, 3H), has b_ih
        gh = jnp.dot(hb, w_hh, preferred_element_type=jnp.float32) + b_hh
        r = _sigmoid(gi[:, 0:H] + gh[:, 0:H])
        z = _sigmoid(gi[:, H:2 * H] + gh[:, H:2 * H])
        n = jnp.tanh(gi[:, 2 * H:3 * H] + r * gh[:, 2 * H:3 * H])
        h = (1.0 - z) * n + z * h
        hb = h.astype(jnp.bfloat16)
        outs.append(h)

    h_ref[...] = h
    hb_ref[...] = hb
    out_f = jnp.stack(outs, axis=0)
    out_b = jnp.stack(outs[::-1], axis=0)
    o_ref[...] = jnp.where(bwd, out_b, out_f).astype(o_ref.dtype)


# ---------------------------------------------------------------------------
# Functional forward (both directions fused into the two pallas_calls).
# ---------------------------------------------------------------------------


@functools.partial(jax.jit, static_argnames=("cell_type", "hidden", "bi_dir"))
def _rnn_forward(x, w_ih, w_hh, b_proj, b_hh, *, cell_type, hidden, bi_dir):
    T, B, D_in = x.shape
    H = hidden
    n_dirs = 2 if bi_dir else 1
    n_gates = 4 if cell_type == "lstm" else 3
    G = n_gates * H

    assert H % 128 == 0, "hidden dim must be a multiple of 128 (lane width)"

    # Timesteps per grid step (amortize per-step overhead, keep unroll bounded).
    tchunk = min(8, T)
    while T % tchunk:
        tchunk -= 1
    nchunks = T // tchunk

    x_bf = x.astype(jnp.bfloat16).reshape(T * B, D_in)

    # ---- Phase 1: gi = x @ W_ih + bias, for all timesteps & directions. ----
    gi = pl.pallas_call(
        _proj_kernel,
        out_shape=jax.ShapeDtypeStruct((n_dirs, T * B, G), jnp.float32),
        grid=(n_dirs,),
        in_specs=[
            pl.BlockSpec((T * B, D_in), lambda d: (0, 0)),
            pl.BlockSpec((1, D_in, G), lambda d: (d, 0, 0)),
            pl.BlockSpec((1, 1, G), lambda d: (d, 0, 0)),
        ],
        out_specs=pl.BlockSpec((1, T * B, G), lambda d: (d, 0, 0)),
        compiler_params=pltpu.CompilerParams(
            dimension_semantics=("parallel",)),
        cost_estimate=pl.CostEstimate(
            flops=2 * n_dirs * T * B * D_in * G,
            transcendentals=0,
            bytes_accessed=(x_bf.size * 2 + w_ih.size * 2
                            + n_dirs * T * B * G * 4)),
    )(x_bf, w_ih, b_proj)
    gi = gi.reshape(n_dirs, T, B, G)

    # ---- Phase 2: the recurrence. ----
    def tmap(d, tc):
        # forward (d=0): chunk tc;  backward (d=1): chunk nchunks-1-tc.
        return tc + d * (nchunks - 1 - 2 * tc)

    if cell_type == "lstm":
        kernel = functools.partial(_lstm_rec_kernel, hidden=H, tchunk=tchunk)
        in_specs = [
            pl.BlockSpec((1, tchunk, B, G), lambda d, tc: (d, tmap(d, tc), 0, 0)),
            pl.BlockSpec((1, H, G), lambda d, tc: (d, 0, 0)),
        ]
        inputs = (gi, w_hh)
        scratch = [pltpu.VMEM((B, H), jnp.bfloat16),     # bf16 shadow of h
                   pltpu.VMEM((B, H), jnp.float32)]      # c
        trans_per_step = 5                               # 3 sigmoid + 2 tanh
    else:
        kernel = functools.partial(_gru_rec_kernel, hidden=H, tchunk=tchunk)
        in_specs = [
            pl.BlockSpec((1, tchunk, B, G), lambda d, tc: (d, tmap(d, tc), 0, 0)),
            pl.BlockSpec((1, H, G), lambda d, tc: (d, 0, 0)),
            pl.BlockSpec((1, 1, G), lambda d, tc: (d, 0, 0)),
        ]
        inputs = (gi, w_hh, b_hh)
        scratch = [pltpu.VMEM((B, H), jnp.float32),      # h (f32 state)
                   pltpu.VMEM((B, H), jnp.bfloat16)]     # bf16 shadow of h
        trans_per_step = 3                               # 2 sigmoid + 1 tanh

    out = pl.pallas_call(
        kernel,
        out_shape=jax.ShapeDtypeStruct((T, B, n_dirs * H), jnp.float32),
        grid=(n_dirs, nchunks),
        in_specs=in_specs,
        out_specs=pl.BlockSpec((tchunk, B, H),
                               lambda d, tc: (tmap(d, tc), 0, d)),
        scratch_shapes=scratch,
        compiler_params=pltpu.CompilerParams(
            # direction axis is independent (megacore), time carries recurrence
            dimension_semantics=("parallel", "arbitrary")),
        cost_estimate=pl.CostEstimate(
            flops=2 * n_dirs * T * B * H * G,
            transcendentals=n_dirs * T * B * H * trans_per_step,
            bytes_accessed=(n_dirs * T * B * G * 4 + w_hh.size * 2
                            + T * B * n_dirs * H * 4)),
    )(*inputs)
    return out


# ---------------------------------------------------------------------------
# Module port.
# ---------------------------------------------------------------------------


class RNN:
    """JAX/Pallas port of the PyTorch RNN module (batch mode)."""

    def __init__(self, input_dim, out_dim, cell_type="lstm", bi_dir=False,
                 key=None):
        if key is None:
            key = jax.random.PRNGKey(0)
        assert cell_type in ("lstm", "gru")
        self.input_dim = input_dim
        self.out_dim = out_dim
        self.cell_type = cell_type
        self.bi_dir = bi_dir
        self.mode = "batch"
        self.hidden_dim = out_dim // 2 if bi_dir else out_dim
        n_dirs = 2 if bi_dir else 1

        n_gates = 4 if cell_type == "lstm" else 3
        G = n_gates * self.hidden_dim
        bound = 1.0 / (self.hidden_dim ** 0.5)
        kwi, kwh, kbi, kbh = jax.random.split(key, 4)
        # Pre-transposed, direction-stacked; bf16 weights for the MXU.
        self.w_ih = jax.random.uniform(kwi, (n_dirs, input_dim, G), jnp.float32,
                                       -bound, bound).astype(jnp.bfloat16)
        self.w_hh = jax.random.uniform(kwh, (n_dirs, self.hidden_dim, G),
                                       jnp.float32, -bound,
                                       bound).astype(jnp.bfloat16)
        self.b_ih = jax.random.uniform(kbi, (n_dirs, 1, G), jnp.float32,
                                       -bound, bound)
        self.b_hh = jax.random.uniform(kbh, (n_dirs, 1, G), jnp.float32,
                                       -bound, bound)
        # LSTM gates see b_ih + b_hh additively -> fold into the projection.
        # GRU b_hn is gated by r, so b_hh must stay inside the recurrence.
        self.b_proj = (self.b_ih + self.b_hh if cell_type == "lstm"
                       else self.b_ih)

    def set_mode(self, mode):
        self.mode = mode

    def __call__(self, x):
        # TODO(synk): 'step' mode (persistent hx/cx across single-step calls)
        # is not ported; only the default 'batch' sequence mode is implemented.
        assert self.mode == "batch"
        return _rnn_forward(x, self.w_ih, self.w_hh, self.b_proj, self.b_hh,
                            cell_type=self.cell_type, hidden=self.hidden_dim,
                            bi_dir=self.bi_dir)


# ---------------------------------------------------------------------------
# Pure-JAX reference (mirrors the kernel's bf16 matmul / f32 accumulate).
# ---------------------------------------------------------------------------


def _reference_forward(x, rnn):
    H = rnn.hidden_dim
    T, B, _ = x.shape
    n_dirs = 2 if rnn.bi_dir else 1

    def run(d, reverse):
        w_ih, w_hh = rnn.w_ih[d], rnn.w_hh[d]
        b_ih, b_hh = rnn.b_ih[d], rnn.b_hh[d]
        h = jnp.zeros((B, H), jnp.float32)
        c = jnp.zeros((B, H), jnp.float32)
        outs = [None] * T
        order = range(T - 1, -1, -1) if reverse else range(T)
        for t in order:
            x_t = x[t].astype(jnp.bfloat16)
            hb = h.astype(jnp.bfloat16)
            if rnn.cell_type == "lstm":
                gates = (jnp.dot(x_t, w_ih, preferred_element_type=jnp.float32)
                         + jnp.dot(hb, w_hh, preferred_element_type=jnp.float32)
                         + b_ih + b_hh)
                i = jax.nn.sigmoid(gates[:, 0:H])
                f = jax.nn.sigmoid(gates[:, H:2 * H])
                g = jnp.tanh(gates[:, 2 * H:3 * H])
                o = jax.nn.sigmoid(gates[:, 3 * H:4 * H])
                c = f * c + i * g
                h = o * jnp.tanh(c)
            else:
                gi = jnp.dot(x_t, w_ih,
                             preferred_element_type=jnp.float32) + b_ih
                gh = jnp.dot(hb, w_hh,
                             preferred_element_type=jnp.float32) + b_hh
                r = jax.nn.sigmoid(gi[:, 0:H] + gh[:, 0:H])
                z = jax.nn.sigmoid(gi[:, H:2 * H] + gh[:, H:2 * H])
                n = jnp.tanh(gi[:, 2 * H:3 * H] + r * gh[:, 2 * H:3 * H])
                h = (1.0 - z) * n + z * h
            outs[t] = h
        return jnp.stack(outs, axis=0)

    out = run(0, reverse=False)
    if n_dirs == 2:
        out = jnp.concatenate((out, run(1, reverse=True)), axis=2)
    return out


if __name__ == "__main__":
    key = jax.random.PRNGKey(0)
    T, B, D_in = 8, 8, 32

    key, kx = jax.random.split(key)
    x = jax.random.normal(kx, (T, B, D_in), jnp.float32)

    # 1) uni-directional LSTM
    key, k1 = jax.random.split(key)
    rnn_lstm = RNN(D_in, 128, cell_type="lstm", bi_dir=False, key=k1)
    out1 = jax.block_until_ready(rnn_lstm(x))
    ref1 = _reference_forward(x, rnn_lstm)
    assert out1.shape == (T, B, 128)
    assert jnp.allclose(out1, ref1, atol=2e-2, rtol=2e-2), \
        float(jnp.max(jnp.abs(out1 - ref1)))

    # 2) bi-directional LSTM (both directions fused into one pallas_call)
    key, k2 = jax.random.split(key)
    rnn_bi = RNN(D_in, 256, cell_type="lstm", bi_dir=True, key=k2)
    out2 = jax.block_until_ready(rnn_bi(x))
    ref2 = _reference_forward(x, rnn_bi)
    assert out2.shape == (T, B, 256)
    assert jnp.allclose(out2, ref2, atol=2e-2, rtol=2e-2), \
        float(jnp.max(jnp.abs(out2 - ref2)))

    # 3) uni-directional GRU
    key, k3 = jax.random.split(key)
    rnn_gru = RNN(D_in, 128, cell_type="gru", bi_dir=False, key=k3)
    out3 = jax.block_until_ready(rnn_gru(x))
    ref3 = _reference_forward(x, rnn_gru)
    assert out3.shape == (T, B, 128)
    assert jnp.allclose(out3, ref3, atol=2e-2, rtol=2e-2), \
        float(jnp.max(jnp.abs(out3 - ref3)))

    print("KERNEL_OK")
</pallas_src>

<mosaic_0001>
module attributes {stable_mosaic.version = 11 : i64} {
  func.func @_lstm_rec_kernel(%arg0: i32, %arg1: i32, %arg2: memref<1x8x8x512xf32, #tpu.memory_space<vmem>>, %arg3: memref<1x128x512xbf16, #tpu.memory_space<vmem>>, %arg4: memref<8x8x128xf32, #tpu.memory_space<vmem>>, %arg5: memref<8x128xbf16, #tpu.memory_space<vmem>>, %arg6: memref<8x128xf32, #tpu.memory_space<vmem>>) attributes {dimension_semantics = [#tpu.dimension_semantics<parallel>, #tpu.dimension_semantics<arbitrary>], iteration_bounds = array<i64: 1, 1>, scalar_prefetch = 0 : i64, scratch_operands = 2 : i64, tpu.core_type = #tpu.core_type<tc>, window_params = [{transform_indices = @transform_0, window_bounds = array<i64: 1, 8, 8, 512>}, {transform_indices = @transform_1, window_bounds = array<i64: 1, 128, 512>}, {transform_indices = @transform_2, window_bounds = array<i64: 8, 8, 128>}]} {
    %c1_i32 = arith.constant 1 : i32
    %0 = arith.cmpi eq, %arg0, %c1_i32 : i32
    %c0_i32 = arith.constant 0 : i32
    %1 = arith.cmpi eq, %arg1, %c0_i32 : i32
    %2 = arith.extui %1 : i1 to i32
    %c0_i32_0 = arith.constant 0 : i32
    %3 = arith.cmpi ne, %2, %c0_i32_0 : i32
    scf.if %3 {
      %cst_150 = arith.constant 0.000000e+00 : bf16
      %342 = vector.broadcast %cst_150 : bf16 to vector<8x128xbf16>
      %c0_151 = arith.constant 0 : index
      %c0_152 = arith.constant 0 : index
      %343 = vector.load %arg5[%c0_151, %c0_152] : memref<8x128xbf16, #tpu.memory_space<vmem>>, vector<8x128xbf16>
      tpu.vector_store %arg5[%c0_151, %c0_152], %342 {strides = array<i32>} : memref<8x128xbf16, #tpu.memory_space<vmem>>, vector<8x128xbf16>,
      %cst_153 = arith.constant 0.000000e+00 : f32
      %344 = vector.broadcast %cst_153 : f32 to vector<8x128xf32>
      %c0_154 = arith.constant 0 : index
      %c0_155 = arith.constant 0 : index
      %345 = vector.load %arg6[%c0_154, %c0_155] : memref<8x128xf32, #tpu.memory_space<vmem>>, vector<8x128xf32>
      tpu.vector_store %arg6[%c0_154, %c0_155], %344 {strides = array<i32>} : memref<8x128xf32, #tpu.memory_space<vmem>>, vector<8x128xf32>,
    } else {
    }
    %c0 = arith.constant 0 : index
    %c0_1 = arith.constant 0 : index
    %c0_2 = arith.constant 0 : index
    %4 = vector.load %arg3[%c0, %c0_1, %c0_2] : memref<1x128x512xbf16, #tpu.memory_space<vmem>>, vector<1x128x512xbf16>
    %5 = vector.shape_cast %4 : vector<1x128x512xbf16> to vector<128x512xbf16>
    %c0_3 = arith.constant 0 : index
    %c0_4 = arith.constant 0 : index
    %6 = vector.load %arg5[%c0_3, %c0_4] : memref<8x128xbf16, #tpu.memory_space<vmem>>, vector<8x128xbf16>
    %c0_5 = arith.constant 0 : index
    %c0_6 = arith.constant 0 : index
    %7 = vector.load %arg6[%c0_5, %c0_6] : memref<8x128xf32, #tpu.memory_space<vmem>>, vector<8x128xf32>
    %c0_7 = arith.constant 0 : index
    %c0_8 = arith.constant 0 : index
    %c0_9 = arith.constant 0 : index
    %c0_10 = arith.constant 0 : index
    %8 = vector.load %arg2[%c0_7, %c0_8, %c0_9, %c0_10] : memref<1x8x8x512xf32, #tpu.memory_space<vmem>>, vector<1x1x8x512xf32>
    %9 = vector.shape_cast %8 : vector<1x1x8x512xf32> to vector<8x512xf32>
    %c0_11 = arith.constant 0 : index
    %c7 = arith.constant 7 : index
    %c0_12 = arith.constant 0 : index
    %c0_13 = arith.constant 0 : index
    %10 = vector.load %arg2[%c0_11, %c7, %c0_12, %c0_13] : memref<1x8x8x512xf32, #tpu.memory_space<vmem>>, vector<1x1x8x512xf32>
    %11 = vector.shape_cast %10 : vector<1x1x8x512xf32> to vector<8x512xf32>
    %12 = arith.select %0, %11, %9 : vector<8x512xf32>
    %cst = arith.constant dense<0.000000e+00> : vector<8x512xf32>
    %13 = tpu.matmul %6, %5, %cst {dimension_numbers = #tpu.dot_dimension_numbers<[1], [0], [0], [1], [0, 0, 1, 1], [], []>} : vector<8x128xbf16>, vector<128x512xbf16>, vector<8x512xf32> -> vector<8x512xf32>
    %14 = arith.addf %12, %13 : vector<8x512xf32>
    %15 = vector.extract_strided_slice %14 {offsets = [0, 0], sizes = [8, 128], strides = [1, 1]} : vector<8x512xf32> to vector<8x128xf32>
    %cst_14 = arith.constant 5.000000e-01 : f32
    %16 = vector.broadcast %cst_14 : f32 to vector<8x128xf32>
    %17 = arith.mulf %16, %15 : vector<8x128xf32>
    %18 = math.tanh %17 : vector<8x128xf32>
    %cst_15 = arith.constant 5.000000e-01 : f32
    %19 = vector.broadcast %cst_15 : f32 to vector<8x128xf32>
    %20 = arith.mulf %19, %18 : vector<8x128xf32>
    %cst_16 = arith.constant 5.000000e-01 : f32
    %21 = vector.broadcast %cst_16 : f32 to vector<8x128xf32>
    %22 = arith.addf %20, %21 : vector<8x128xf32>
    %23 = vector.extract_strided_slice %14 {offsets = [0, 128], sizes = [8, 128], strides = [1, 1]} : vector<8x512xf32> to vector<8x128xf32>
    %cst_17 = arith.constant 5.000000e-01 : f32
    %24 = vector.broadcast %cst_17 : f32 to vector<8x128xf32>
    %25 = arith.mulf %24, %23 : vector<8x128xf32>
    %26 = math.tanh %25 : vector<8x128xf32>
    %cst_18 = arith.constant 5.000000e-01 : f32
    %27 = vector.broadcast %cst_18 : f32 to vector<8x128xf32>
    %28 = arith.mulf %27, %26 : vector<8x128xf32>
    %cst_19 = arith.constant 5.000000e-01 : f32
    %29 = vector.broadcast %cst_19 : f32 to vector<8x128xf32>
    %30 = arith.addf %28, %29 : vector<8x128xf32>
    %31 = vector.extract_strided_slice %14 {offsets = [0, 256], sizes = [8, 128], strides = [1, 1]} : vector<8x512xf32> to vector<8x128xf32>
    %32 = math.tanh %31 : vector<8x128xf32>
    %33 = vector.extract_strided_slice %14 {offsets = [0, 384], sizes = [8, 128], strides = [1, 1]} : vector<8x512xf32> to vector<8x128xf32>
    %cst_20 = arith.constant 5.000000e-01 : f32
    %34 = vector.broadcast %cst_20 : f32 to vector<8x128xf32>
    %35 = arith.mulf %34, %33 : vector<8x128xf32>
    %36 = math.tanh %35 : vector<8x128xf32>
    %cst_21 = arith.constant 5.000000e-01 : f32
    %37 = vector.broadcast %cst_21 : f32 to vector<8x128xf32>
    %38 = arith.mulf %37, %36 : vector<8x128xf32>
    %cst_22 = arith.constant 5.000000e-01 : f32
    %39 = vector.broadcast %cst_22 : f32 to vector<8x128xf32>
    %40 = arith.addf %38, %39 : vector<8x128xf32>
    %41 = arith.mulf %30, %7 : vector<8x128xf32>
    %42 = arith.mulf %22, %32 : vector<8x128xf32>
    %43 = arith.addf %41, %42 : vector<8x128xf32>
    %44 = math.tanh %43 : vector<8x128xf32>
    %45 = arith.mulf %40, %44 : vector<8x128xf32>
    %46 = arith.truncf %45 : vector<8x128xf32> to vector<8x128xbf16>
    %c0_23 = arith.constant 0 : index
    %c1 = arith.constant 1 : index
    %c0_24 = arith.constant 0 : index
    %c0_25 = arith.constant 0 : index
    %47 = vector.load %arg2[%c0_23, %c1, %c0_24, %c0_25] : memref<1x8x8x512xf32, #tpu.memory_space<vmem>>, vector<1x1x8x512xf32>
    %48 = vector.shape_cast %47 : vector<1x1x8x512xf32> to vector<8x512xf32>
    %c0_26 = arith.constant 0 : index
    %c6 = arith.constant 6 : index
    %c0_27 = arith.constant 0 : index
    %c0_28 = arith.constant 0 : index
    %49 = vector.load %arg2[%c0_26, %c6, %c0_27, %c0_28] : memref<1x8x8x512xf32, #tpu.memory_space<vmem>>, vector<1x1x8x512xf32>
    %50 = vector.shape_cast %49 : vector<1x1x8x512xf32> to vector<8x512xf32>
    %51 = arith.select %0, %50, %48 : vector<8x512xf32>
    %cst_29 = arith.constant dense<0.000000e+00> : vector<8x512xf32>
    %52 = tpu.matmul %46, %5, %cst_29 {dimension_numbers = #tpu.dot_dimension_numbers<[1], [0], [0], [1], [0, 0, 1, 1], [], []>} : vector<8x128xbf16>, vector<128x512xbf16>, vector<8x512xf32> -> vector<8x512xf32>
    %53 = arith.addf %51, %52 : vector<8x512xf32>
    %54 = vector.extract_strided_slice %53 {offsets = [0, 0], sizes = [8, 128], strides = [1, 1]} : vector<8x512xf32> to vector<8x128xf32>
    %cst_30 = arith.constant 5.000000e-01 : f32
    %55 = vector.broadcast %cst_30 : f32 to vector<8x128xf32>
    %56 = arith.mulf %55, %54 : vector<8x128xf32>
    %57 = math.tanh %56 : vector<8x128xf32>
    %cst_31 = arith.constant 5.000000e-01 : f32
    %58 = vector.broadcast %cst_31 : f32 to vector<8x128xf32>
    %59 = arith.mulf %58, %57 : vector<8x128xf32>
    %cst_32 = arith.constant 5.000000e-01 : f32
    %60 = vector.broadcast %cst_32 : f32 to vector<8x128xf32>
    %61 = arith.addf %59, %60 : vector<8x128xf32>
    %62 = vector.extract_strided_slice %53 {offsets = [0, 128], sizes = [8, 128], strides = [1, 1]} : vector<8x512xf32> to vector<8x128xf32>
    %cst_33 = arith.constant 5.000000e-01 : f32
    %63 = vector.broadcast %cst_33 : f32 to vector<8x128xf32>
    %64 = arith.mulf %63, %62 : vector<8x128xf32>
    %65 = math.tanh %64 : vector<8x128xf32>
    %cst_34 = arith.constant 5.000000e-01 : f32
    %66 = vector.broadcast %cst_34 : f32 to vector<8x128xf32>
    %67 = arith.mulf %66, %65 : vector<8x128xf32>
    %cst_35 = arith.constant 5.000000e-01 : f32
    %68 = vector.broadcast %cst_35 : f32 to vector<8x128xf32>
    %69 = arith.addf %67, %68 : vector<8x128xf32>
    %70 = vector.extract_strided_slice %53 {offsets = [0, 256], sizes = [8, 128], strides = [1, 1]} : vector<8x512xf32> to vector<8x128xf32>
    %71 = math.tanh %70 : vector<8x128xf32>
    %72 = vector.extract_strided_slice %53 {offsets = [0, 384], sizes = [8, 128], strides = [1, 1]} : vector<8x512xf32> to vector<8x128xf32>
    %cst_36 = arith.constant 5.000000e-01 : f32
    %73 = vector.broadcast %cst_36 : f32 to vector<8x128xf32>
    %74 = arith.mulf %73, %72 : vector<8x128xf32>
    %75 = math.tanh %74 : vector<8x128xf32>
    %cst_37 = arith.constant 5.000000e-01 : f32
    %76 = vector.broadcast %cst_37 : f32 to vector<8x128xf32>
    %77 = arith.mulf %76, %75 : vector<8x128xf32>
    %cst_38 = arith.constant 5.000000e-01 : f32
    %78 = vector.broadcast %cst_38 : f32 to vector<8x128xf32>
    %79 = arith.addf %77, %78 : vector<8x128xf32>
    %80 = arith.mulf %69, %43 : vector<8x128xf32>
    %81 = arith.mulf %61, %71 : vector<8x128xf32>
    %82 = arith.addf %80, %81 : vector<8x128xf32>
    %83 = math.tanh %82 : vector<8x128xf32>
    %84 = arith.mulf %79, %83 : vector<8x128xf32>
    %85 = arith.truncf %84 : vector<8x128xf32> to vector<8x128xbf16>
    %c0_39 = arith.constant 0 : index
    %c2 = arith.constant 2 : index
    %c0_40 = arith.constant 0 : index
    %c0_41 = arith.constant 0 : index
    %86 = vector.load %arg2[%c0_39, %c2, %c0_40, %c0_41] : memref<1x8x8x512xf32, #tpu.memory_space<vmem>>, vector<1x1x8x512xf32>
    %87 = vector.shape_cast %86 : vector<1x1x8x512xf32> to vector<8x512xf32>
    %c0_42 = arith.constant 0 : index
    %c5 = arith.constant 5 : index
    %c0_43 = arith.constant 0 : index
    %c0_44 = arith.constant 0 : index
    %88 = vector.load %arg2[%c0_42, %c5, %c0_43, %c0_44] : memref<1x8x8x512xf32, #tpu.memory_space<vmem>>, vector<1x1x8x512xf32>
    %89 = vector.shape_cast %88 : vector<1x1x8x512xf32> to vector<8x512xf32>
    %90 = arith.select %0, %89, %87 : vector<8x512xf32>
    %cst_45 = arith.constant dense<0.000000e+00> : vector<8x512xf32>
    %91 = tpu.matmul %85, %5, %cst_45 {dimension_numbers = #tpu.dot_dimension_numbers<[1], [0], [0], [1], [0, 0, 1, 1], [], []>} : vector<8x128xbf16>, vector<128x512xbf16>, vector<8x512xf32> -> vector<8x512xf32>
    %92 = arith.addf %90, %91 : vector<8x512xf32>
    %93 = vector.extract_strided_slice %92 {offsets = [0, 0], sizes = [8, 128], strides = [1, 1]} : vector<8x512xf32> to vector<8x128xf32>
    %cst_46 = arith.constant 5.000000e-01 : f32
    %94 = vector.broadcast %cst_46 : f32 to vector<8x128xf32>
    %95 = arith.mulf %94, %93 : vector<8x128xf32>
    %96 = math.tanh %95 : vector<8x128xf32>
    %cst_47 = arith.constant 5.000000e-01 : f32
    %97 = vector.broadcast %cst_47 : f32 to vector<8x128xf32>
    %98 = arith.mulf %97, %96 : vector<8x128xf32>
    %cst_48 = arith.constant 5.000000e-01 : f32
    %99 = vector.broadcast %cst_48 : f32 to vector<8x128xf32>
    %100 = arith.addf %98, %99 : vector<8x128xf32>
    %101 = vector.extract_strided_slice %92 {offsets = [0, 128], sizes = [8, 128], strides = [1, 1]} : vector<8x512xf32> to vector<8x128xf32>
    %cst_49 = arith.constant 5.000000e-01 : f32
    %102 = vector.broadcast %cst_49 : f32 to vector<8x128xf32>
    %103 = arith.mulf %102, %101 : vector<8x128xf32>
    %104 = math.tanh %103 : vector<8x128xf32>
    %cst_50 = arith.constant 5.000000e-01 : f32
    %105 = vector.broadcast %cst_50 : f32 to vector<8x128xf32>
    %106 = arith.mulf %105, %104 : vector<8x128xf32>
    %cst_51 = arith.constant 5.000000e-01 : f32
    %107 = vector.broadcast %cst_51 : f32 to vector<8x128xf32>
    %108 = arith.addf %106, %107 : vector<8x128xf32>
    %109 = vector.extract_strided_slice %92 {offsets = [0, 256], sizes = [8, 128], strides = [1, 1]} : vector<8x512xf32> to vector<8x128xf32>
    %110 = math.tanh %109 : vector<8x128xf32>
    %111 = vector.extract_strided_slice %92 {offsets = [0, 384], sizes = [8, 128], strides = [1, 1]} : vector<8x512xf32> to vector<8x128xf32>
    %cst_52 = arith.constant 5.000000e-01 : f32
    %112 = vector.broadcast %cst_52 : f32 to vector<8x128xf32>
    %113 = arith.mulf %112, %111 : vector<8x128xf32>
    %114 = math.tanh %113 : vector<8x128xf32>
    %cst_53 = arith.constant 5.000000e-01 : f32
    %115 = vector.broadcast %cst_53 : f32 to vector<8x128xf32>
    %116 = arith.mulf %115, %114 : vector<8x128xf32>
    %cst_54 = arith.constant 5.000000e-01 : f32
    %117 = vector.broadcast %cst_54 : f32 to vector<8x128xf32>
    %118 = arith.addf %116, %117 : vector<8x128xf32>
    %119 = arith.mulf %108, %82 : vector<8x128xf32>
    %120 = arith.mulf %100, %110 : vector<8x128xf32>
    %121 = arith.addf %119, %120 : vector<8x128xf32>
    %122 = math.tanh %121 : vector<8x128xf32>
    %123 = arith.mulf %118, %122 : vector<8x128xf32>
    %124 = arith.truncf %123 : vector<8x128xf32> to vector<8x128xbf16>
    %c0_55 = arith.constant 0 : index
    %c3 = arith.constant 3 : index
    %c0_56 = arith.constant 0 : index
    %c0_57 = arith.constant 0 : index
    %125 = vector.load %arg2[%c0_55, %c3, %c0_56, %c0_57] : memref<1x8x8x512xf32, #tpu.memory_space<vmem>>, vector<1x1x8x512xf32>
    %126 = vector.shape_cast %125 : vector<1x1x8x512xf32> to vector<8x512xf32>
    %c0_58 = arith.constant 0 : index
    %c4 = arith.constant 4 : index
    %c0_59 = arith.constant 0 : index
    %c0_60 = arith.constant 0 : index
    %127 = vector.load %arg2[%c0_58, %c4, %c0_59, %c0_60] : memref<1x8x8x512xf32, #tpu.memory_space<vmem>>, vector<1x1x8x512xf32>
    %128 = vector.shape_cast %127 : vector<1x1x8x512xf32> to vector<8x512xf32>
    %129 = arith.select %0, %128, %126 : vector<8x512xf32>
    %cst_61 = arith.constant dense<0.000000e+00> : vector<8x512xf32>
    %130 = tpu.matmul %124, %5, %cst_61 {dimension_numbers = #tpu.dot_dimension_numbers<[1], [0], [0], [1], [0, 0, 1, 1], [], []>} : vector<8x128xbf16>, vector<128x512xbf16>, vector<8x512xf32> -> vector<8x512xf32>
    %131 = arith.addf %129, %130 : vector<8x512xf32>
    %132 = vector.extract_strided_slice %131 {offsets = [0, 0], sizes = [8, 128], strides = [1, 1]} : vector<8x512xf32> to vector<8x128xf32>
    %cst_62 = arith.constant 5.000000e-01 : f32
    %133 = vector.broadcast %cst_62 : f32 to vector<8x128xf32>
    %134 = arith.mulf %133, %132 : vector<8x128xf32>
    %135 = math.tanh %134 : vector<8x128xf32>
    %cst_63 = arith.constant 5.000000e-01 : f32
    %136 = vector.broadcast %cst_63 : f32 to vector<8x128xf32>
    %137 = arith.mulf %136, %135 : vector<8x128xf32>
    %cst_64 = arith.constant 5.000000e-01 : f32
    %138 = vector.broadcast %cst_64 : f32 to vector<8x128xf32>
    %139 = arith.addf %137, %138 : vector<8x128xf32>
    %140 = vector.extract_strided_slice %131 {offsets = [0, 128], sizes = [8, 128], strides = [1, 1]} : vector<8x512xf32> to vector<8x128xf32>
    %cst_65 = arith.constant 5.000000e-01 : f32
    %141 = vector.broadcast %cst_65 : f32 to vector<8x128xf32>
    %142 = arith.mulf %141, %140 : vector<8x128xf32>
    %143 = math.tanh %142 : vector<8x128xf32>
    %cst_66 = arith.constant 5.000000e-01 : f32
    %144 = vector.broadcast %cst_66 : f32 to vector<8x128xf32>
    %145 = arith.mulf %144, %143 : vector<8x128xf32>
    %cst_67 = arith.constant 5.000000e-01 : f32
    %146 = vector.broadcast %cst_67 : f32 to vector<8x128xf32>
    %147 = arith.addf %145, %146 : vector<8x128xf32>
    %148 = vector.extract_strided_slice %131 {offsets = [0, 256], sizes = [8, 128], strides = [1, 1]} : vector<8x512xf32> to vector<8x128xf32>
    %149 = math.tanh %148 : vector<8x128xf32>
    %150 = vector.extract_strided_slice %131 {offsets = [0, 384], sizes = [8, 128], strides = [1, 1]} : vector<8x512xf32> to vector<8x128xf32>
    %cst_68 = arith.constant 5.000000e-01 : f32
    %151 = vector.broadcast %cst_68 : f32 to vector<8x128xf32>
    %152 = arith.mulf %151, %150 : vector<8x128xf32>
    %153 = math.tanh %152 : vector<8x128xf32>
    %cst_69 = arith.constant 5.000000e-01 : f32
    %154 = vector.broadcast %cst_69 : f32 to vector<8x128xf32>
    %155 = arith.mulf %154, %153 : vector<8x128xf32>
    %cst_70 = arith.constant 5.000000e-01 : f32
    %156 = vector.broadcast %cst_70 : f32 to vector<8x128xf32>
    %157 = arith.addf %155, %156 : vector<8x128xf32>
    %158 = arith.mulf %147, %121 : vector<8x128xf32>
    %159 = arith.mulf %139, %149 : vector<8x128xf32>
    %160 = arith.addf %158, %159 : vector<8x128xf32>
    %161 = math.tanh %160 : vector<8x128xf32>
    %162 = arith.mulf %157, %161 : vector<8x128xf32>
    %163 = arith.truncf %162 : vector<8x128xf32> to vector<8x128xbf16>
    %c0_71 = arith.constant 0 : index
    %c4_72 = arith.constant 4 : index
    %c0_73 = arith.constant 0 : index
    %c0_74 = arith.constant 0 : index
    %164 = vector.load %arg2[%c0_71, %c4_72, %c0_73, %c0_74] : memref<1x8x8x512xf32, #tpu.memory_space<vmem>>, vector<1x1x8x512xf32>
    %165 = vector.shape_cast %164 : vector<1x1x8x512xf32> to vector<8x512xf32>
    %c0_75 = arith.constant 0 : index
    %c3_76 = arith.constant 3 : index
    %c0_77 = arith.constant 0 : index
    %c0_78 = arith.constant 0 : index
    %166 = vector.load %arg2[%c0_75, %c3_76, %c0_77, %c0_78] : memref<1x8x8x512xf32, #tpu.memory_space<vmem>>, vector<1x1x8x512xf32>
    %167 = vector.shape_cast %166 : vector<1x1x8x512xf32> to vector<8x512xf32>
    %168 = arith.select %0, %167, %165 : vector<8x512xf32>
    %cst_79 = arith.constant dense<0.000000e+00> : vector<8x512xf32>
    %169 = tpu.matmul %163, %5, %cst_79 {dimension_numbers = #tpu.dot_dimension_numbers<[1], [0], [0], [1], [0, 0, 1, 1], [], []>} : vector<8x128xbf16>, vector<128x512xbf16>, vector<8x512xf32> -> vector<8x512xf32>
    %170 = arith.addf %168, %169 : vector<8x512xf32>
    %171 = vector.extract_strided_slice %170 {offsets = [0, 0], sizes = [8, 128], strides = [1, 1]} : vector<8x512xf32> to vector<8x128xf32>
    %cst_80 = arith.constant 5.000000e-01 : f32
    %172 = vector.broadcast %cst_80 : f32 to vector<8x128xf32>
    %173 = arith.mulf %172, %171 : vector<8x128xf32>
    %174 = math.tanh %173 : vector<8x128xf32>
    %cst_81 = arith.constant 5.000000e-01 : f32
    %175 = vector.broadcast %cst_81 : f32 to vector<8x128xf32>
    %176 = arith.mulf %175, %174 : vector<8x128xf32>
    %cst_82 = arith.constant 5.000000e-01 : f32
    %177 = vector.broadcast %cst_82 : f32 to vector<8x128xf32>
    %178 = arith.addf %176, %177 : vector<8x128xf32>
    %179 = vector.extract_strided_slice %170 {offsets = [0, 128], sizes = [8, 128], strides = [1, 1]} : vector<8x512xf32> to vector<8x128xf32>
    %cst_83 = arith.constant 5.000000e-01 : f32
    %180 = vector.broadcast %cst_83 : f32 to vector<8x128xf32>
    %181 = arith.mulf %180, %179 : vector<8x128xf32>
    %182 = math.tanh %181 : vector<8x128xf32>
    %cst_84 = arith.constant 5.000000e-01 : f32
    %183 = vector.broadcast %cst_84 : f32 to vector<8x128xf32>
    %184 = arith.mulf %183, %182 : vector<8x128xf32>
    %cst_85 = arith.constant 5.000000e-01 : f32
    %185 = vector.broadcast %cst_85 : f32 to vector<8x128xf32>
    %186 = arith.addf %184, %185 : vector<8x128xf32>
    %187 = vector.extract_strided_slice %170 {offsets = [0, 256], sizes = [8, 128], strides = [1, 1]} : vector<8x512xf32> to vector<8x128xf32>
    %188 = math.tanh %187 : vector<8x128xf32>
    %189 = vector.extract_strided_slice %170 {offsets = [0, 384], sizes = [8, 128], strides = [1, 1]} : vector<8x512xf32> to vector<8x128xf32>
    %cst_86 = arith.constant 5.000000e-01 : f32
    %190 = vector.broadcast %cst_86 : f32 to vector<8x128xf32>
    %191 = arith.mulf %190, %189 : vector<8x128xf32>
    %192 = math.tanh %191 : vector<8x128xf32>
    %cst_87 = arith.constant 5.000000e-01 : f32
    %193 = vector.broadcast %cst_87 : f32 to vector<8x128xf32>
    %194 = arith.mulf %193, %192 : vector<8x128xf32>
    %cst_88 = arith.constant 5.000000e-01 : f32
    %195 = vector.broadcast %cst_88 : f32 to vector<8x128xf32>
    %196 = arith.addf %194, %195 : vector<8x128xf32>
    %197 = arith.mulf %186, %160 : vector<8x128xf32>
    %198 = arith.mulf %178, %188 : vector<8x128xf32>
    %199 = arith.addf %197, %198 : vector<8x128xf32>
    %200 = math.tanh %199 : vector<8x128xf32>
    %201 = arith.mulf %196, %200 : vector<8x128xf32>
    %202 = arith.truncf %201 : vector<8x128xf32> to vector<8x128xbf16>
    %c0_89 = arith.constant 0 : index
    %c5_90 = arith.constant 5 : index
    %c0_91 = arith.constant 0 : index
    %c0_92 = arith.constant 0 : index
    %203 = vector.load %arg2[%c0_89, %c5_90, %c0_91, %c0_92] : memref<1x8x8x512xf32, #tpu.memory_space<vmem>>, vector<1x1x8x512xf32>
    %204 = vector.shape_cast %203 : vector<1x1x8x512xf32> to vector<8x512xf32>
    %c0_93 = arith.constant 0 : index
    %c2_94 = arith.constant 2 : index
    %c0_95 = arith.constant 0 : index
    %c0_96 = arith.constant 0 : index
    %205 = vector.load %arg2[%c0_93, %c2_94, %c0_95, %c0_96] : memref<1x8x8x512xf32, #tpu.memory_space<vmem>>, vector<1x1x8x512xf32>
    %206 = vector.shape_cast %205 : vector<1x1x8x512xf32> to vector<8x512xf32>
    %207 = arith.select %0, %206, %204 : vector<8x512xf32>
    %cst_97 = arith.constant dense<0.000000e+00> : vector<8x512xf32>
    %208 = tpu.matmul %202, %5, %cst_97 {dimension_numbers = #tpu.dot_dimension_numbers<[1], [0], [0], [1], [0, 0, 1, 1], [], []>} : vector<8x128xbf16>, vector<128x512xbf16>, vector<8x512xf32> -> vector<8x512xf32>
    %209 = arith.addf %207, %208 : vector<8x512xf32>
    %210 = vector.extract_strided_slice %209 {offsets = [0, 0], sizes = [8, 128], strides = [1, 1]} : vector<8x512xf32> to vector<8x128xf32>
    %cst_98 = arith.constant 5.000000e-01 : f32
    %211 = vector.broadcast %cst_98 : f32 to vector<8x128xf32>
    %212 = arith.mulf %211, %210 : vector<8x128xf32>
    %213 = math.tanh %212 : vector<8x128xf32>
    %cst_99 = arith.constant 5.000000e-01 : f32
    %214 = vector.broadcast %cst_99 : f32 to vector<8x128xf32>
    %215 = arith.mulf %214, %213 : vector<8x128xf32>
    %cst_100 = arith.constant 5.000000e-01 : f32
    %216 = vector.broadcast %cst_100 : f32 to vector<8x128xf32>
    %217 = arith.addf %215, %216 : vector<8x128xf32>
    %218 = vector.extract_strided_slice %209 {offsets = [0, 128], sizes = [8, 128], strides = [1, 1]} : vector<8x512xf32> to vector<8x128xf32>
    %cst_101 = arith.constant 5.000000e-01 : f32
    %219 = vector.broadcast %cst_101 : f32 to vector<8x128xf32>
    %220 = arith.mulf %219, %218 : vector<8x128xf32>
    %221 = math.tanh %220 : vector<8x128xf32>
    %cst_102 = arith.constant 5.000000e-01 : f32
    %222 = vector.broadcast %cst_102 : f32 to vector<8x128xf32>
    %223 = arith.mulf %222, %221 : vector<8x128xf32>
    %cst_103 = arith.constant 5.000000e-01 : f32
    %224 = vector.broadcast %cst_103 : f32 to vector<8x128xf32>
    %225 = arith.addf %223, %224 : vector<8x128xf32>
    %226 = vector.extract_strided_slice %209 {offsets = [0, 256], sizes = [8, 128], strides = [1, 1]} : vector<8x512xf32> to vector<8x128xf32>
    %227 = math.tanh %226 : vector<8x128xf32>
    %228 = vector.extract_strided_slice %209 {offsets = [0, 384], sizes = [8, 128], strides = [1, 1]} : vector<8x512xf32> to vector<8x128xf32>
    %cst_104 = arith.constant 5.000000e-01 : f32
    %229 = vector.broadcast %cst_104 : f32 to vector<8x128xf32>
    %230 = arith.mulf %229, %228 : vector<8x128xf32>
    %231 = math.tanh %230 : vector<8x128xf32>
    %cst_105 = arith.constant 5.000000e-01 : f32
    %232 = vector.broadcast %cst_105 : f32 to vector<8x128xf32>
    %233 = arith.mulf %232, %231 : vector<8x128xf32>
    %cst_106 = arith.constant 5.000000e-01 : f32
    %234 = vector.broadcast %cst_106 : f32 to vector<8x128xf32>
    %235 = arith.addf %233, %234 : vector<8x128xf32>
    %236 = arith.mulf %225, %199 : vector<8x128xf32>
    %237 = arith.mulf %217, %227 : vector<8x128xf32>
    %238 = arith.addf %236, %237 : vector<8x128xf32>
    %239 = math.tanh %238 : vector<8x128xf32>
    %240 = arith.mulf %235, %239 : vector<8x128xf32>
    %241 = arith.truncf %240 : vector<8x128xf32> to vector<8x128xbf16>
    %c0_107 = arith.constant 0 : index
    %c6_108 = arith.constant 6 : index
    %c0_109 = arith.constant 0 : index
    %c0_110 = arith.constant 0 : index
    %242 = vector.load %arg2[%c0_107, %c6_108, %c0_109, %c0_110] : memref<1x8x8x512xf32, #tpu.memory_space<vmem>>, vector<1x1x8x512xf32>
    %243 = vector.shape_cast %242 : vector<1x1x8x512xf32> to vector<8x512xf32>
    %c0_111 = arith.constant 0 : index
    %c1_112 = arith.constant 1 : index
    %c0_113 = arith.constant 0 : index
    %c0_114 = arith.constant 0 : index
    %244 = vector.load %arg2[%c0_111, %c1_112, %c0_113, %c0_114] : memref<1x8x8x512xf32, #tpu.memory_space<vmem>>, vector<1x1x8x512xf32>
    %245 = vector.shape_cast %244 : vector<1x1x8x512xf32> to vector<8x512xf32>
    %246 = arith.select %0, %245, %243 : vector<8x512xf32>
    %cst_115 = arith.constant dense<0.000000e+00> : vector<8x512xf32>
    %247 = tpu.matmul %241, %5, %cst_115 {dimension_numbers = #tpu.dot_dimension_numbers<[1], [0], [0], [1], [0, 0, 1, 1], [], []>} : vector<8x128xbf16>, vector<128x512xbf16>, vector<8x512xf32> -> vector<8x512xf32>
    %248 = arith.addf %246, %247 : vector<8x512xf32>
    %249 = vector.extract_strided_slice %248 {offsets = [0, 0], sizes = [8, 128], strides = [1, 1]} : vector<8x512xf32> to vector<8x128xf32>
    %cst_116 = arith.constant 5.000000e-01 : f32
    %250 = vector.broadcast %cst_116 : f32 to vector<8x128xf32>
    %251 = arith.mulf %250, %249 : vector<8x128xf32>
    %252 = math.tanh %251 : vector<8x128xf32>
    %cst_117 = arith.constant 5.000000e-01 : f32
    %253 = vector.broadcast %cst_117 : f32 to vector<8x128xf32>
    %254 = arith.mulf %253, %252 : vector<8x128xf32>
    %cst_118 = arith.constant 5.000000e-01 : f32
    %255 = vector.broadcast %cst_118 : f32 to vector<8x128xf32>
    %256 = arith.addf %254, %255 : vector<8x128xf32>
    %257 = vector.extract_strided_slice %248 {offsets = [0, 128], sizes = [8, 128], strides = [1, 1]} : vector<8x512xf32> to vector<8x128xf32>
    %cst_119 = arith.constant 5.000000e-01 : f32
    %258 = vector.broadcast %cst_119 : f32 to vector<8x128xf32>
    %259 = arith.mulf %258, %257 : vector<8x128xf32>
    %260 = math.tanh %259 : vector<8x128xf32>
    %cst_120 = arith.constant 5.000000e-01 : f32
    %261 = vector.broadcast %cst_120 : f32 to vector<8x128xf32>
    %262 = arith.mulf %261, %260 : vector<8x128xf32>
    %cst_121 = arith.constant 5.000000e-01 : f32
    %263 = vector.broadcast %cst_121 : f32 to vector<8x128xf32>
    %264 = arith.addf %262, %263 : vector<8x128xf32>
    %265 = vector.extract_strided_slice %248 {offsets = [0, 256], sizes = [8, 128], strides = [1, 1]} : vector<8x512xf32> to vector<8x128xf32>
    %266 = math.tanh %265 : vector<8x128xf32>
    %267 = vector.extract_strided_slice %248 {offsets = [0, 384], sizes = [8, 128], strides = [1, 1]} : vector<8x512xf32> to vector<8x128xf32>
    %cst_122 = arith.constant 5.000000e-01 : f32
    %268 = vector.broadcast %cst_122 : f32 to vector<8x128xf32>
    %269 = arith.mulf %268, %267 : vector<8x128xf32>
    %270 = math.tanh %269 : vector<8x128xf32>
    %cst_123 = arith.constant 5.000000e-01 : f32
    %271 = vector.broadcast %cst_123 : f32 to vector<8x128xf32>
    %272 = arith.mulf %271, %270 : vector<8x128xf32>
    %cst_124 = arith.constant 5.000000e-01 : f32
    %273 = vector.broadcast %cst_124 : f32 to vector<8x128xf32>
    %274 = arith.addf %272, %273 : vector<8x128xf32>
    %275 = arith.mulf %264, %238 : vector<8x128xf32>
    %276 = arith.mulf %256, %266 : vector<8x128xf32>
    %277 = arith.addf %275, %276 : vector<8x128xf32>
    %278 = math.tanh %277 : vector<8x128xf32>
    %279 = arith.mulf %274, %278 : vector<8x128xf32>
    %280 = arith.truncf %279 : vector<8x128xf32> to vector<8x128xbf16>
    %c0_125 = arith.constant 0 : index
    %c7_126 = arith.constant 7 : index
    %c0_127 = arith.constant 0 : index
    %c0_128 = arith.constant 0 : index
    %281 = vector.load %arg2[%c0_125, %c7_126, %c0_127, %c0_128] : memref<1x8x8x512xf32, #tpu.memory_space<vmem>>, vector<1x1x8x512xf32>
    %282 = vector.shape_cast %281 : vector<1x1x8x512xf32> to vector<8x512xf32>
    %c0_129 = arith.constant 0 : index
    %c0_130 = arith.constant 0 : index
    %c0_131 = arith.constant 0 : index
    %c0_132 = arith.constant 0 : index
    %283 = vector.load %arg2[%c0_129, %c0_130, %c0_131, %c0_132] : memref<1x8x8x512xf32, #tpu.memory_space<vmem>>, vector<1x1x8x512xf32>
    %284 = vector.shape_cast %283 : vector<1x1x8x512xf32> to vector<8x512xf32>
    %285 = arith.select %0, %284, %282 : vector<8x512xf32>
    %cst_133 = arith.constant dense<0.000000e+00> : vector<8x512xf32>
    %286 = tpu.matmul %280, %5, %cst_133 {dimension_numbers = #tpu.dot_dimension_numbers<[1], [0], [0], [1], [0, 0, 1, 1], [], []>} : vector<8x128xbf16>, vector<128x512xbf16>, vector<8x512xf32> -> vector<8x512xf32>
    %287 = arith.addf %285, %286 : vector<8x512xf32>
    %288 = vector.extract_strided_slice %287 {offsets = [0, 0], sizes = [8, 128], strides = [1, 1]} : vector<8x512xf32> to vector<8x128xf32>
    %cst_134 = arith.constant 5.000000e-01 : f32
    %289 = vector.broadcast %cst_134 : f32 to vector<8x128xf32>
    %290 = arith.mulf %289, %288 : vector<8x128xf32>
    %291 = math.tanh %290 : vector<8x128xf32>
    %cst_135 = arith.constant 5.000000e-01 : f32
    %292 = vector.broadcast %cst_135 : f32 to vector<8x128xf32>
    %293 = arith.mulf %292, %291 : vector<8x128xf32>
    %cst_136 = arith.constant 5.000000e-01 : f32
    %294 = vector.broadcast %cst_136 : f32 to vector<8x128xf32>
    %295 = arith.addf %293, %294 : vector<8x128xf32>
    %296 = vector.extract_strided_slice %287 {offsets = [0, 128], sizes = [8, 128], strides = [1, 1]} : vector<8x512xf32> to vector<8x128xf32>
    %cst_137 = arith.constant 5.000000e-01 : f32
    %297 = vector.broadcast %cst_137 : f32 to vector<8x128xf32>
    %298 = arith.mulf %297, %296 : vector<8x128xf32>
    %299 = math.tanh %298 : vector<8x128xf32>
    %cst_138 = arith.constant 5.000000e-01 : f32
    %300 = vector.broadcast %cst_138 : f32 to vector<8x128xf32>
    %301 = arith.mulf %300, %299 : vector<8x128xf32>
    %cst_139 = arith.constant 5.000000e-01 : f32
    %302 = vector.broadcast %cst_139 : f32 to vector<8x128xf32>
    %303 = arith.addf %301, %302 : vector<8x128xf32>
    %304 = vector.extract_strided_slice %287 {offsets = [0, 256], sizes = [8, 128], strides = [1, 1]} : vector<8x512xf32> to vector<8x128xf32>
    %305 = math.tanh %304 : vector<8x128xf32>
    %306 = vector.extract_strided_slice %287 {offsets = [0, 384], sizes = [8, 128], strides = [1, 1]} : vector<8x512xf32> to vector<8x128xf32>
    %cst_140 = arith.constant 5.000000e-01 : f32
    %307 = vector.broadcast %cst_140 : f32 to vector<8x128xf32>
    %308 = arith.mulf %307, %306 : vector<8x128xf32>
    %309 = math.tanh %308 : vector<8x128xf32>
    %cst_141 = arith.constant 5.000000e-01 : f32
    %310 = vector.broadcast %cst_141 : f32 to vector<8x128xf32>
    %311 = arith.mulf %310, %309 : vector<8x128xf32>
    %cst_142 = arith.constant 5.000000e-01 : f32
    %312 = vector.broadcast %cst_142 : f32 to vector<8x128xf32>
    %313 = arith.addf %311, %312 : vector<8x128xf32>
    %314 = arith.mulf %303, %277 : vector<8x128xf32>
    %315 = arith.mulf %295, %305 : vector<8x128xf32>
    %316 = arith.addf %314, %315 : vector<8x128xf32>
    %317 = math.tanh %316 : vector<8x128xf32>
    %318 = arith.mulf %313, %317 : vector<8x128xf32>
    %319 = arith.truncf %318 : vector<8x128xf32> to vector<8x128xbf16>
    %c0_143 = arith.constant 0 : index
    %c0_144 = arith.constant 0 : index
    %320 = vector.load %arg5[%c0_143, %c0_144] : memref<8x128xbf16, #tpu.memory_space<vmem>>, vector<8x128xbf16>
    tpu.vector_store %arg5[%c0_143, %c0_144], %319 {strides = array<i32>} : memref<8x128xbf16, #tpu.memory_space<vmem>>, vector<8x128xbf16>,
    %c0_145 = arith.constant 0 : index
    %c0_146 = arith.constant 0 : index
    %321 = vector.load %arg6[%c0_145, %c0_146] : memref<8x128xf32, #tpu.memory_space<vmem>>, vector<8x128xf32>
    tpu.vector_store %arg6[%c0_145, %c0_146], %316 {strides = array<i32>} : memref<8x128xf32, #tpu.memory_space<vmem>>, vector<8x128xf32>,
    %322 = vector.shape_cast %45 : vector<8x128xf32> to vector<1x8x128xf32>
    %323 = vector.shape_cast %84 : vector<8x128xf32> to vector<1x8x128xf32>
    %324 = vector.shape_cast %123 : vector<8x128xf32> to vector<1x8x128xf32>
    %325 = vector.shape_cast %162 : vector<8x128xf32> to vector<1x8x128xf32>
    %326 = vector.shape_cast %201 : vector<8x128xf32> to vector<1x8x128xf32>
    %327 = vector.shape_cast %240 : vector<8x128xf32> to vector<1x8x128xf32>
    %328 = vector.shape_cast %279 : vector<8x128xf32> to vector<1x8x128xf32>
    %329 = vector.shape_cast %318 : vector<8x128xf32> to vector<1x8x128xf32>
    %330 = tpu.concatenate %322, %323, %324, %325, %326, %327, %328, %329 in 0 : vector<1x8x128xf32>, vector<1x8x128xf32>, vector<1x8x128xf32>, vector<1x8x128xf32>, vector<1x8x128xf32>, vector<1x8x128xf32>, vector<1x8x128xf32>, vector<1x8x128xf32> -> vector<8x8x128xf32>
    %331 = vector.shape_cast %318 : vector<8x128xf32> to vector<1x8x128xf32>
    %332 = vector.shape_cast %279 : vector<8x128xf32> to vector<1x8x128xf32>
    %333 = vector.shape_cast %240 : vector<8x128xf32> to vector<1x8x128xf32>
    %334 = vector.shape_cast %201 : vector<8x128xf32> to vector<1x8x128xf32>
    %335 = vector.shape_cast %162 : vector<8x128xf32> to vector<1x8x128xf32>
    %336 = vector.shape_cast %123 : vector<8x128xf32> to vector<1x8x128xf32>
    %337 = vector.shape_cast %84 : vector<8x128xf32> to vector<1x8x128xf32>
    %338 = vector.shape_cast %45 : vector<8x128xf32> to vector<1x8x128xf32>
    %339 = tpu.concatenate %331, %332, %333, %334, %335, %336, %337, %338 in 0 : vector<1x8x128xf32>, vector<1x8x128xf32>, vector<1x8x128xf32>, vector<1x8x128xf32>, vector<1x8x128xf32>, vector<1x8x128xf32>, vector<1x8x128xf32>, vector<1x8x128xf32> -> vector<8x8x128xf32>
    %340 = arith.select %0, %339, %330 : vector<8x8x128xf32>
    %c0_147 = arith.constant 0 : index
    %c0_148 = arith.constant 0 : index
    %c0_149 = arith.constant 0 : index
    %341 = vector.load %arg4[%c0_147, %c0_148, %c0_149] : memref<8x8x128xf32, #tpu.memory_space<vmem>>, vector<8x8x128xf32>
    tpu.vector_store %arg4[%c0_147, %c0_148, %c0_149], %340 {strides = array<i32>} : memref<8x8x128xf32, #tpu.memory_space<vmem>>, vector<8x8x128xf32>,
    return
  }
  func.func @transform_0(%arg0: i32, %arg1: i32) -> (i32, i32, i32, i32) {
    %c2_i32 = arith.constant 2 : i32
    %0 = arith.muli %c2_i32, %arg1 : i32
    %c0_i32 = arith.constant 0 : i32
    %1 = arith.subi %c0_i32, %0 : i32
    %2 = arith.muli %arg0, %1 : i32
    %3 = arith.addi %arg1, %2 : i32
    %c0_i32_0 = arith.constant 0 : i32
    %c0_i32_1 = arith.constant 0 : i32
    %c0_i32_2 = arith.constant 0 : i32
    return %arg0, %3, %c0_i32_0, %c0_i32_1 : i32, i32, i32, i32
  }
  func.func @transform_1(%arg0: i32, %arg1: i32) -> (i32, i32, i32) {
    %c0_i32 = arith.constant 0 : i32
    %c0_i32_0 = arith.constant 0 : i32
    %c0_i32_1 = arith.constant 0 : i32
    return %arg0, %c0_i32, %c0_i32_0 : i32, i32, i32
  }
  func.func @transform_2(%arg0: i32, %arg1: i32) -> (i32, i32, i32) {
    %c2_i32 = arith.constant 2 : i32
    %0 = arith.muli %c2_i32, %arg1 : i32
    %c0_i32 = arith.constant 0 : i32
    %1 = arith.subi %c0_i32, %0 : i32
    %2 = arith.muli %arg0, %1 : i32
    %3 = arith.addi %arg1, %2 : i32
    %c0_i32_0 = arith.constant 0 : i32
    %c0_i32_1 = arith.constant 0 : i32
    return %3, %c0_i32_0, %arg0 : i32, i32, i32
  }
}

module attributes {stable_mosaic.version = 11 : i64} {
  func.func @_proj_kernel(%arg0: i32, %arg1: memref<64x32xbf16, #tpu.memory_space<vmem>>, %arg2: memref<1x32x512xbf16, #tpu.memory_space<vmem>>, %arg3: memref<1x1x512xf32, #tpu.memory_space<vmem>>, %arg4: memref<1x64x512xf32, #tpu.memory_space<vmem>>) attributes {dimension_semantics = [#tpu.dimension_semantics<parallel>], iteration_bounds = array<i64: 1>, scalar_prefetch = 0 : i64, scratch_operands = 0 : i64, tpu.core_type = #tpu.core_type<tc>, window_params = [{pipeline_mode = #tpu.pipeline_mode<synchronous>, transform_indices = @transform_0, window_bounds = array<i64: 64, 32>}, {transform_indices = @transform_1, window_bounds = array<i64: 1, 32, 512>}, {transform_indices = @transform_2, window_bounds = array<i64: 1, 1, 512>}, {transform_indices = @transform_3, window_bounds = array<i64: 1, 64, 512>}]} {
    %c0 = arith.constant 0 : index
    %c0_0 = arith.constant 0 : index
    %0 = vector.load %arg1[%c0, %c0_0] : memref<64x32xbf16, #tpu.memory_space<vmem>>, vector<64x32xbf16>
    %c0_1 = arith.constant 0 : index
    %c0_2 = arith.constant 0 : index
    %c0_3 = arith.constant 0 : index
    %1 = vector.load %arg2[%c0_1, %c0_2, %c0_3] : memref<1x32x512xbf16, #tpu.memory_space<vmem>>, vector<1x32x512xbf16>
    %2 = vector.shape_cast %1 : vector<1x32x512xbf16> to vector<32x512xbf16>
    %cst = arith.constant dense<0.000000e+00> : vector<64x512xf32>
    %3 = tpu.matmul %0, %2, %cst {dimension_numbers = #tpu.dot_dimension_numbers<[1], [0], [0], [1], [0, 0, 1, 1], [], []>} : vector<64x32xbf16>, vector<32x512xbf16>, vector<64x512xf32> -> vector<64x512xf32>
    %c0_4 = arith.constant 0 : index
    %c0_5 = arith.constant 0 : index
    %c0_6 = arith.constant 0 : index
    %4 = vector.load %arg3[%c0_4, %c0_5, %c0_6] : memref<1x1x512xf32, #tpu.memory_space<vmem>>, vector<1x1x512xf32>
    %5 = vector.shape_cast %4 : vector<1x1x512xf32> to vector<1x512xf32>
    %6 = vector.broadcast %5 : vector<1x512xf32> to vector<64x512xf32>
    %7 = arith.addf %3, %6 : vector<64x512xf32>
    %c0_7 = arith.constant 0 : index
    %c0_8 = arith.constant 0 : index
    %c0_9 = arith.constant 0 : index
    %8 = vector.load %arg4[%c0_7, %c0_8, %c0_9] : memref<1x64x512xf32, #tpu.memory_space<vmem>>, vector<1x64x512xf32>
    %9 = vector.shape_cast %8 : vector<1x64x512xf32> to vector<64x512xf32>
    %10 = vector.shape_cast %7 : vector<64x512xf32> to vector<1x64x512xf32>
    tpu.vector_store %arg4[%c0_7, %c0_8, %c0_9], %10 {strides = array<i32>} : memref<1x64x512xf32, #tpu.memory_space<vmem>>, vector<1x64x512xf32>,
    return
  }
  func.func @transform_0(%arg0: i32) -> (i32, i32) {
    %c0_i32 = arith.constant 0 : i32
    %c0_i32_0 = arith.constant 0 : i32
    %c0_i32_1 = arith.constant 0 : i32
    return %c0_i32, %c0_i32_0 : i32, i32
  }
  func.func @transform_1(%arg0: i32) -> (i32, i32, i32) {
    %c0_i32 = arith.constant 0 : i32
    %c0_i32_0 = arith.constant 0 : i32
    %c0_i32_1 = arith.constant 0 : i32
    return %arg0, %c0_i32, %c0_i32_0 : i32, i32, i32
  }
  func.func @transform_2(%arg0: i32) -> (i32, i32, i32) {
    %c0_i32 = arith.constant 0 : i32
    %c0_i32_0 = arith.constant 0 : i32
    %c0_i32_1 = arith.constant 0 : i32
    return %arg0, %c0_i32, %c0_i32_0 : i32, i32, i32
  }
  func.func @transform_3(%arg0: i32) -> (i32, i32, i32) {
    %c0_i32 = arith.constant 0 : i32
    %c0_i32_0 = arith.constant 0 : i32
    %c0_i32_1 = arith.constant 0 : i32
    return %arg0, %c0_i32, %c0_i32_0 : i32, i32, i32
  }
}

</mosaic_0001>

<bundles_post_ra>
// kernel: _rnn_forward.2
= control target key start
LH: loop header
LB: loop body
LE: loop exit
PB: predicated region body
PF: predicated region fallthrough
CT: control target
= control target key end

     0   :  { %8 = vsyncpa [#allocation3], 0  ;;  %s624_s0 = inlined_call_operand.vmem [shape: bf16[64,32], index: 0, kind: input, shape index: {}]   ;;  %s625_s1 = inlined_call_operand.hbm [shape: bf16[1,32,512], index: 1, kind: input, shape index: {}]   ;;  %s626_s2 = inlined_call_operand.hbm [shape: f32[1,1,512], index: 2, kind: input, shape index: {}]   ;;  %s627_s3 = inlined_call_operand.vmem [shape: f32[1,64,512], index: 3, kind: output, shape index: {}]  }
   0x1   :  { %s16_s14 = sshll.u32 %s625_s1, 4  ;;  %s17_s14 = int_to_ptr.hbm [resolvable:$true] %s16_s14 }
   0x2   :  { %9 = vsyncpa [#allocation5], 0  ;;  %s430_s15 = smov [#allocation2]   ;;  %s30_s19 = sshll.u32 %s626_s2, 4  ;;  %s31_s19 = int_to_ptr.hbm [resolvable:$true] %s30_s19 }
   0x3   :  { %s18_s16 = sshll.u32 %s430_s15, 4  ;;  %s431_s20 = smov 256   ;;  %s19_s16 = int_to_ptr.vmem [resolvable:$true] %s18_s16 }
   0x4   :  { %s432_s21 = smov 16   ;;  %s433_s22 = smov [#allocation4]  }
   0x5   :  { %24 = dma.hbm_to_vmem [thread:$0]  %s17_s14, 1024, %s19_s16, [#allocation3], %s431_s20, %s431_s20, %s432_s21  }
   0x6   :  { %s32_s23 = sshll.u32 %s433_s22, 4  ;;  %s33_s23 = int_to_ptr.vmem [resolvable:$true] %s32_s23 }
   0x7   :  { %35 = dma.hbm_to_vmem [thread:$0]  %s31_s19, 64, %s33_s23, [#allocation5]  }
   0x8   :  { %426 = dma.done.wait [#allocation3], 1024  }
   0x9   :  { %427 = vsyncadd [#allocation3], 4294966272 }
   0xa   :  { %428 = dma.done.wait [#allocation5], 64  }
   0xb   :  { %429 = vsyncadd [#allocation5], 4294967232  ;;  %v332_v0 = vld [vmem:[#allocation2 + $0x20] sm:$0xf]  ;;  %v372_v1 = vld [vmem:[#allocation2 + $0x2c] sm:$0xf0] }
   0xc   :  { %v370_v2 = vld [vmem:[#allocation2 + $0x24] sm:$0xf]  ;;  %v333_v3 = vor.u32 %v372_v1, %v332_v0  ;;  %v334_v4 = vld [vmem:[#allocation2 + $0x30] sm:$0xf0]  ;;  %v340_v5 = vld [vmem:[#allocation2 + $0x28] sm:$0xf] }
   0xd   :  { %v373_v6 = vld [vmem:[#allocation2 + $0x34] sm:$0xf0]  ;;  %v337_v7 = vor.u32 %v370_v2, %v334_v4  ;;  %v371_v9 = vld [vmem:[#allocation2 + $0x2c] sm:$0xf]  ;;  %v342_v10 = vld [vmem:[#allocation2 + $0x38] sm:$0xf0] }
   0xe   :  { %v341_v8 = vor.u32 %v373_v6, %v340_v5  ;;  %v316_v11 = vld [vmem:[#allocation2] sm:$0xf]  ;;  %150 = vmatpush.bf16.msra.mxu0 %v333_v3  ;;  %v345_v12 = vor.u32 %v371_v9, %v342_v10  ;;  %v368_v13 = vld [vmem:[#allocation2 + $0xc] sm:$0xf0]  ;;  %v366_v14 = vld [vmem:[#allocation2 + $0x4] sm:$0xf] }
   0xf   :  { %v318_v15 = vld [vmem:[#allocation2 + $0x10] sm:$0xf0]  ;;  %179 = vmatpush.bf16.msra.mxu1 %v337_v7  ;;  %v317_v16 = vor.u32 %v368_v13, %v316_v11  ;;  %v324_v18 = vld [vmem:[#allocation2 + $0x8] sm:$0xf]  ;;  %v369_v19 = vld [vmem:[#allocation2 + $0x14] sm:$0xf0] }
  0x10   :  { %208 = vmatpush.bf16.msra.mxu2 %v341_v8  ;;  %v321_v17 = vor.u32 %v366_v14, %v318_v15  ;;  %v367_v20 = vld [vmem:[#allocation2 + $0xc] sm:$0xf]  ;;  %237 = vmatpush.bf16.msra.mxu3 %v345_v12  ;;  %v325_v21 = vor.u32 %v369_v19, %v324_v18  ;;  %v326_v22 = vld [vmem:[#allocation2 + $0x18] sm:$0xf0]  ;;  %v362_v24 = vld [vmem:[%s624_s0] sm:$0xff]  ;;  %vm131_vm0 = vcmask 261120  }
  0x11   :  { %v329_v23 = vor.u32 %v367_v20, %v326_v22  ;;  %v363_v25 = vld [vmem:[%s624_s0 + $0x8] sm:$0xff]  ;;  %v364_v26 = vld [vmem:[%s624_s0 + $0x10] sm:$0xff]  ;;  %v365_v27 = vld [vmem:[%s624_s0 + $0x18] sm:$0xff] }
  0x12   :  { %151 = vmatpush.bf16.msra.mxu0 %v317_v16  ;;  %v61_v28 = vld [vmem:[#allocation4] sm:$0xf] }
  0x13   :  { %180 = vmatpush.bf16.msra.mxu1 %v321_v17  ;;  %v488_v29 = vperm.slane %v61_v28, 0  ;;  %v490_v30 = vperm.slane %v61_v28, 1  ;;  %v500_v35 = vperm.slane %v61_v28, 2  ;;  %v502_v36 = vperm.slane %v61_v28, 3 }
  0x14   :  { %209 = vmatpush.bf16.msra.mxu2 %v325_v21  ;;  %238 = vmatpush.bf16.msra.mxu3 %v329_v23 }
  0x15   :  { %346 = vmatmul.msk.bf16.vlgmr.msra.gmra.mxu0 %vm131_vm0, %v362_v24 }
  0x16   :  { %350 = vmatmul.msk.bf16.vlgmr.msra.gmra.mxu1 %vm131_vm0, %v362_v24 }
  0x17   :  { %354 = vmatmul.msk.bf16.vlgmr.msra.gmra.mxu2 %vm131_vm0, %v362_v24  ;;  %358 = vmatmul.msk.bf16.vlgmr.msra.gmra.mxu3 %vm131_vm0, %v362_v24 }
  0x25   :  { %347 = vmatmul.msk.bf16.gmra.mxu0 %vm131_vm0, %v363_v25 }
  0x26   :  { %351 = vmatmul.msk.bf16.gmra.mxu1 %vm131_vm0, %v363_v25 }
  0x27   :  { %355 = vmatmul.msk.bf16.gmra.mxu2 %vm131_vm0, %v363_v25  ;;  %359 = vmatmul.msk.bf16.gmra.mxu3 %vm131_vm0, %v363_v25 }
  0x35   :  { %348 = vmatmul.msk.bf16.gmra.mxu0 %vm131_vm0, %v364_v26 }
  0x36   :  { %352 = vmatmul.msk.bf16.gmra.mxu1 %vm131_vm0, %v364_v26 }
  0x37   :  { %356 = vmatmul.msk.bf16.gmra.mxu2 %vm131_vm0, %v364_v26  ;;  %360 = vmatmul.msk.bf16.gmra.mxu3 %vm131_vm0, %v364_v26 }
  0x45   :  { %349 = vmatmul.msk.bf16.gmra.mxu0 %vm131_vm0, %v365_v27 }
  0x46   :  { %353 = vmatmul.msk.bf16.gmra.mxu1 %vm131_vm0, %v365_v27 }
  0x47   :  { %357 = vmatmul.msk.bf16.gmra.mxu2 %vm131_vm0, %v365_v27  ;;  %361 = vmatmul.msk.bf16.gmra.mxu3 %vm131_vm0, %v365_v27 }
  0x92   :  { %v153_v31 = vpop.f32.mrf.mxu0 }
  0x93   :  { %v154_v32 = vadd.f32 %v153_v31, %v488_v29  ;;  %v182_v33 = vpop.f32.mrf.mxu1 }
  0x94   :  { %v183_v34 = vadd.f32 %v182_v33, %v490_v30 }
  0x95   :  { %260 = vst [vmem:[%s627_s3] sm:$0xff] %v154_v32 }
  0x96   :  { %261 = vst [vmem:[%s627_s3 + $0x8] sm:$0xff] %v183_v34 }
  0x9a   :  { %v211_v37 = vpop.f32.mrf.mxu2  ;;  %v240_v39 = vpop.f32.mrf.mxu3 }
  0x9b   :  { %v212_v38 = vadd.f32 %v211_v37, %v500_v35  ;;  %v155_v40 = vpop.f32.mrf.mxu0  ;;  %v241_v41 = vadd.f32 %v240_v39, %v502_v36  ;;  %v184_v43 = vpop.f32.mrf.mxu1 }
  0x9c   :  { %v156_v42 = vadd.f32 %v155_v40, %v488_v29  ;;  %v185_v44 = vadd.f32 %v184_v43, %v490_v30 }
  0x9d   :  { %262 = vst [vmem:[%s627_s3 + $0x10] sm:$0xff] %v212_v38 }
  0x9e   :  { %263 = vst [vmem:[%s627_s3 + $0x18] sm:$0xff] %v241_v41 }
  0x9f   :  { %264 = vst [vmem:[%s627_s3 + $0x20] sm:$0xff] %v156_v42 }
  0xa0   :  { %265 = vst [vmem:[%s627_s3 + $0x28] sm:$0xff] %v185_v44 }
  0xa2   :  { %v213_v45 = vpop.f32.mrf.mxu2  ;;  %v242_v47 = vpop.f32.mrf.mxu3 }
  0xa3   :  { %v214_v46 = vadd.f32 %v213_v45, %v500_v35  ;;  %v158_v48 = vpop.f32.mrf.mxu0  ;;  %v243_v49 = vadd.f32 %v242_v47, %v502_v36  ;;  %v187_v51 = vpop.f32.mrf.mxu1 }
  0xa4   :  { %v159_v50 = vadd.f32 %v158_v48, %v488_v29  ;;  %v188_v52 = vadd.f32 %v187_v51, %v490_v30 }
  0xa5   :  { %266 = vst [vmem:[%s627_s3 + $0x30] sm:$0xff] %v214_v46 }
  0xa6   :  { %267 = vst [vmem:[%s627_s3 + $0x38] sm:$0xff] %v243_v49 }
  0xa7   :  { %268 = vst [vmem:[%s627_s3 + $0x40] sm:$0xff] %v159_v50 }
  0xa8   :  { %269 = vst [vmem:[%s627_s3 + $0x48] sm:$0xff] %v188_v52 }
  0xaa   :  { %v216_v53 = vpop.f32.mrf.mxu2  ;;  %v245_v55 = vpop.f32.mrf.mxu3 }
  0xab   :  { %v217_v54 = vadd.f32 %v216_v53, %v500_v35  ;;  %v160_v56 = vpop.f32.mrf.mxu0  ;;  %v246_v57 = vadd.f32 %v245_v55, %v502_v36  ;;  %v189_v59 = vpop.f32.mrf.mxu1 }
  0xac   :  { %v161_v58 = vadd.f32 %v160_v56, %v488_v29  ;;  %v190_v60 = vadd.f32 %v189_v59, %v490_v30 }
  0xad   :  { %270 = vst [vmem:[%s627_s3 + $0x50] sm:$0xff] %v217_v54 }
  0xae   :  { %271 = vst [vmem:[%s627_s3 + $0x58] sm:$0xff] %v246_v57 }
  0xaf   :  { %272 = vst [vmem:[%s627_s3 + $0x60] sm:$0xff] %v161_v58 }
  0xb0   :  { %273 = vst [vmem:[%s627_s3 + $0x68] sm:$0xff] %v190_v60 }
  0xb2   :  { %v218_v61 = vpop.f32.mrf.mxu2  ;;  %v247_v63 = vpop.f32.mrf.mxu3 }
  0xb3   :  { %v219_v62 = vadd.f32 %v218_v61, %v500_v35  ;;  %v163_v0 = vpop.f32.mrf.mxu0  ;;  %v248_v1 = vadd.f32 %v247_v63, %v502_v36  ;;  %v192_v3 = vpop.f32.mrf.mxu1 }
  0xb4   :  { %v164_v2 = vadd.f32 %v163_v0, %v488_v29  ;;  %v193_v4 = vadd.f32 %v192_v3, %v490_v30 }
  0xb5   :  { %274 = vst [vmem:[%s627_s3 + $0x70] sm:$0xff] %v219_v62 }
  0xb6   :  { %275 = vst [vmem:[%s627_s3 + $0x78] sm:$0xff] %v248_v1 }
  0xb7   :  { %276 = vst [vmem:[%s627_s3 + $0x80] sm:$0xff] %v164_v2 }
  0xb8   :  { %277 = vst [vmem:[%s627_s3 + $0x88] sm:$0xff] %v193_v4 }
  0xba   :  { %v221_v5 = vpop.f32.mrf.mxu2  ;;  %v250_v7 = vpop.f32.mrf.mxu3 }
  0xbb   :  { %v222_v6 = vadd.f32 %v221_v5, %v500_v35  ;;  %v165_v8 = vpop.f32.mrf.mxu0  ;;  %v251_v9 = vadd.f32 %v250_v7, %v502_v36  ;;  %v194_v11 = vpop.f32.mrf.mxu1 }
  0xbc   :  { %v166_v10 = vadd.f32 %v165_v8, %v488_v29  ;;  %v195_v12 = vadd.f32 %v194_v11, %v490_v30 }
  0xbd   :  { %278 = vst [vmem:[%s627_s3 + $0x90] sm:$0xff] %v222_v6 }
  0xbe   :  { %279 = vst [vmem:[%s627_s3 + $0x98] sm:$0xff] %v251_v9 }
  0xbf   :  { %280 = vst [vmem:[%s627_s3 + $0xa0] sm:$0xff] %v166_v10 }
  0xc0   :  { %281 = vst [vmem:[%s627_s3 + $0xa8] sm:$0xff] %v195_v12 }
  0xc2   :  { %v223_v13 = vpop.f32.mrf.mxu2  ;;  %v252_v15 = vpop.f32.mrf.mxu3 }
  0xc3   :  { %v224_v14 = vadd.f32 %v223_v13, %v500_v35  ;;  %v168_v16 = vpop.f32.mrf.mxu0  ;;  %v253_v17 = vadd.f32 %v252_v15, %v502_v36  ;;  %v197_v19 = vpop.f32.mrf.mxu1 }
  0xc4   :  { %v169_v18 = vadd.f32 %v168_v16, %v488_v29  ;;  %v198_v20 = vadd.f32 %v197_v19, %v490_v30 }
  0xc5   :  { %282 = vst [vmem:[%s627_s3 + $0xb0] sm:$0xff] %v224_v14 }
  0xc6   :  { %283 = vst [vmem:[%s627_s3 + $0xb8] sm:$0xff] %v253_v17 }
  0xc7   :  { %284 = vst [vmem:[%s627_s3 + $0xc0] sm:$0xff] %v169_v18 }
  0xc8   :  { %285 = vst [vmem:[%s627_s3 + $0xc8] sm:$0xff] %v198_v20 }
  0xca   :  { %v226_v21 = vpop.f32.mrf.mxu2  ;;  %v255_v23 = vpop.f32.mrf.mxu3 }
  0xcb   :  { %v227_v22 = vadd.f32 %v226_v21, %v500_v35  ;;  %v170_v24 = vpop.f32.mrf.mxu0  ;;  %v256_v25 = vadd.f32 %v255_v23, %v502_v36  ;;  %v199_v27 = vpop.f32.mrf.mxu1 }
  0xcc   :  { %v171_v26 = vadd.f32 %v170_v24, %v488_v29  ;;  %v200_v28 = vadd.f32 %v199_v27, %v490_v30 }
  0xcd   :  { %286 = vst [vmem:[%s627_s3 + $0xd0] sm:$0xff] %v227_v22 }
  0xce   :  { %287 = vst [vmem:[%s627_s3 + $0xd8] sm:$0xff] %v256_v25 }
  0xcf   :  { %288 = vst [vmem:[%s627_s3 + $0xe0] sm:$0xff] %v171_v26 }
  0xd0   :  { %289 = vst [vmem:[%s627_s3 + $0xe8] sm:$0xff] %v200_v28 }
  0xd2   :  { %v228_v29 = vpop.f32.mrf.mxu2  ;;  %v257_v32 = vpop.f32.mrf.mxu3 }
  0xd3   :  { %v229_v31 = vadd.f32 %v228_v29, %v500_v35  ;;  %v258_v33 = vadd.f32 %v257_v32, %v502_v36 }
  0xd5   :  { %290 = vst [vmem:[%s627_s3 + $0xf0] sm:$0xff] %v229_v31 }
  0xd6   :  { %291 = vst [vmem:[%s627_s3 + $0xf8] sm:$0xff] %v258_v33 }
  0xd7   :  { %296 = vsyncpa [#allocation3], 1 }
  0xd8   :  { %297 = vsyncpa [#allocation5], 1 }

// kernel: _rnn_forward.3
= control target key start
LH: loop header
LB: loop body
LE: loop exit
PB: predicated region body
PF: predicated region fallthrough
CT: control target
= control target key end

     0   :  { %s1933_s0 = inlined_call_operand.vmem [shape: f32[1,8,8,512], index: 0, kind: input, shape index: {}]   ;;  %s1934_s1 = inlined_call_operand.vmem [shape: bf16[1,128,512], index: 1, kind: input, shape index: {}]   ;;  %s1935_s2 = inlined_call_operand.hbm [shape: f32[8,8,128], index: 2, kind: output, shape index: {}]  }
   0x1   :  { %v1103_v0 = vld [vmem:[%s1934_s1 + $0xe0] sm:$0xf]  ;;  %v1171_v1 = vld [vmem:[%s1934_s1 + $0xec] sm:$0xf0]  ;;  %v1169_v2 = vld [vmem:[%s1934_s1 + $0xe4] sm:$0xf] }
   0x2   :  { %v1311_v3 = vor.u32 %v1171_v1, %v1103_v0  ;;  %v1105_v4 = vld [vmem:[%s1934_s1 + $0xf0] sm:$0xf0]  ;;  %v1111_v5 = vld [vmem:[%s1934_s1 + $0xe8] sm:$0xf]  ;;  %v1172_v6 = vld [vmem:[%s1934_s1 + $0xf4] sm:$0xf0] }
   0x3   :  { %v1322_v7 = vor.u32 %v1169_v2, %v1105_v4  ;;  %v1324_v8 = vor.u32 %v1172_v6, %v1111_v5  ;;  %v1170_v9 = vld [vmem:[%s1934_s1 + $0xec] sm:$0xf]  ;;  %v1113_v10 = vld [vmem:[%s1934_s1 + $0xf8] sm:$0xf0]  ;;  %v1087_v11 = vld [vmem:[%s1934_s1 + $0xc0] sm:$0xf] }
   0x4   :  { %275 = vmatpush.bf16.msra.mxu0 %v1311_v3  ;;  %v1336_v12 = vor.u32 %v1170_v9, %v1113_v10  ;;  %v1167_v13 = vld [vmem:[%s1934_s1 + $0xcc] sm:$0xf0]  ;;  %v1165_v14 = vld [vmem:[%s1934_s1 + $0xc4] sm:$0xf]  ;;  %v1089_v15 = vld [vmem:[%s1934_s1 + $0xd0] sm:$0xf0] }
   0x5   :  { %288 = vmatpush.bf16.msra.mxu1 %v1322_v7  ;;  %301 = vmatpush.bf16.msra.mxu2 %v1324_v8  ;;  %v1349_v16 = vor.u32 %v1167_v13, %v1087_v11  ;;  %v1351_v17 = vor.u32 %v1165_v14, %v1089_v15  ;;  %v1095_v18 = vld [vmem:[%s1934_s1 + $0xc8] sm:$0xf]  ;;  %v1168_v19 = vld [vmem:[%s1934_s1 + $0xd4] sm:$0xf0]  ;;  %v1166_v20 = vld [vmem:[%s1934_s1 + $0xcc] sm:$0xf] }
   0x6   :  { %314 = vmatpush.bf16.msra.mxu3 %v1336_v12  ;;  %v1363_v21 = vor.u32 %v1168_v19, %v1095_v18  ;;  %v1097_v22 = vld [vmem:[%s1934_s1 + $0xd8] sm:$0xf0]  ;;  %v1071_v23 = vld [vmem:[%s1934_s1 + $0xa0] sm:$0xf]  ;;  %v1163_v24 = vld [vmem:[%s1934_s1 + $0xac] sm:$0xf0] }
   0x7   :  { %v1374_v25 = vor.u32 %v1166_v20, %v1097_v22  ;;  %v1161_v26 = vld [vmem:[%s1934_s1 + $0xa4] sm:$0xf]  ;;  %v1073_v27 = vld [vmem:[%s1934_s1 + $0xb0] sm:$0xf0]  ;;  %v1079_v28 = vld [vmem:[%s1934_s1 + $0xa8] sm:$0xf]  ;;  %v1386_v29 = vor.u32 %v1163_v24, %v1071_v23 }
   0x8   :  { %276 = vmatpush.bf16.msra.mxu0 %v1349_v16  ;;  %v1164_v30 = vld [vmem:[%s1934_s1 + $0xb4] sm:$0xf0]  ;;  %v1162_v31 = vld [vmem:[%s1934_s1 + $0xac] sm:$0xf]  ;;  %v1081_v32 = vld [vmem:[%s1934_s1 + $0xb8] sm:$0xf0]  ;;  %v1399_v33 = vor.u32 %v1161_v26, %v1073_v27 }
   0x9   :  { %289 = vmatpush.bf16.msra.mxu1 %v1351_v17  ;;  %302 = vmatpush.bf16.msra.mxu2 %v1363_v21  ;;  %v1401_v34 = vor.u32 %v1164_v30, %v1079_v28  ;;  %v1055_v35 = vld [vmem:[%s1934_s1 + $0x80] sm:$0xf]  ;;  %v1159_v36 = vld [vmem:[%s1934_s1 + $0x8c] sm:$0xf0]  ;;  %v1157_v37 = vld [vmem:[%s1934_s1 + $0x84] sm:$0xf]  ;;  %v1413_v38 = vor.u32 %v1162_v31, %v1081_v32 }
   0xa   :  { %315 = vmatpush.bf16.msra.mxu3 %v1374_v25  ;;  %v1057_v39 = vld [vmem:[%s1934_s1 + $0x90] sm:$0xf0]  ;;  %v1063_v40 = vld [vmem:[%s1934_s1 + $0x88] sm:$0xf]  ;;  %v1160_v41 = vld [vmem:[%s1934_s1 + $0x94] sm:$0xf0]  ;;  %v1431_v44 = vor.u32 %v1159_v36, %v1055_v35 }
   0xb   :  { %v1158_v42 = vld [vmem:[%s1934_s1 + $0x8c] sm:$0xf]  ;;  %v1065_v43 = vld [vmem:[%s1934_s1 + $0x98] sm:$0xf0]  ;;  %v1435_v45 = vor.u32 %v1157_v37, %v1057_v39  ;;  %v1437_v46 = vor.u32 %v1160_v41, %v1063_v40  ;;  %v1039_v47 = vld [vmem:[%s1934_s1 + $0x60] sm:$0xf] }
   0xc   :  { %277 = vmatpush.bf16.msra.mxu0 %v1386_v29  ;;  %v1155_v48 = vld [vmem:[%s1934_s1 + $0x6c] sm:$0xf0]  ;;  %v1153_v49 = vld [vmem:[%s1934_s1 + $0x64] sm:$0xf]  ;;  %v1449_v50 = vor.u32 %v1158_v42, %v1065_v43  ;;  %v1041_v51 = vld [vmem:[%s1934_s1 + $0x70] sm:$0xf0] }
   0xd   :  { %290 = vmatpush.bf16.msra.mxu1 %v1399_v33  ;;  %303 = vmatpush.bf16.msra.mxu2 %v1401_v34  ;;  %v1047_v52 = vld [vmem:[%s1934_s1 + $0x68] sm:$0xf]  ;;  %v1156_v53 = vld [vmem:[%s1934_s1 + $0x74] sm:$0xf0]  ;;  %v1154_v54 = vld [vmem:[%s1934_s1 + $0x6c] sm:$0xf]  ;;  %v1467_v56 = vor.u32 %v1155_v48, %v1039_v47  ;;  %v1471_v57 = vor.u32 %v1153_v49, %v1041_v51 }
   0xe   :  { %316 = vmatpush.bf16.msra.mxu3 %v1413_v38  ;;  %v1049_v55 = vld [vmem:[%s1934_s1 + $0x78] sm:$0xf0]  ;;  %v1473_v58 = vor.u32 %v1156_v53, %v1047_v52  ;;  %v1023_v59 = vld [vmem:[%s1934_s1 + $0x40] sm:$0xf]  ;;  %v1151_v60 = vld [vmem:[%s1934_s1 + $0x4c] sm:$0xf0] }
   0xf   :  { %v1149_v61 = vld [vmem:[%s1934_s1 + $0x44] sm:$0xf]  ;;  %v1485_v62 = vor.u32 %v1154_v54, %v1049_v55  ;;  %v1025_v63 = vld [vmem:[%s1934_s1 + $0x50] sm:$0xf0]  ;;  %v1031_v0 = vld [vmem:[%s1934_s1 + $0x48] sm:$0xf]  ;;  %v1503_v5 = vor.u32 %v1151_v60, %v1023_v59 }
  0x10   :  { %278 = vmatpush.bf16.msra.mxu0 %v1431_v44  ;;  %v1152_v1 = vld [vmem:[%s1934_s1 + $0x54] sm:$0xf0]  ;;  %v1150_v2 = vld [vmem:[%s1934_s1 + $0x4c] sm:$0xf]  ;;  %v1033_v4 = vld [vmem:[%s1934_s1 + $0x58] sm:$0xf0]  ;;  %v1513_v10 = vor.u32 %v1149_v61, %v1025_v63 }
  0x11   :  { %291 = vmatpush.bf16.msra.mxu1 %v1435_v45  ;;  %304 = vmatpush.bf16.msra.mxu2 %v1437_v46  ;;  %v1007_v6 = vld [vmem:[%s1934_s1 + $0x20] sm:$0xf]  ;;  %v1147_v9 = vld [vmem:[%s1934_s1 + $0x2c] sm:$0xf0]  ;;  %v1515_v11 = vor.u32 %v1152_v1, %v1031_v0  ;;  %v1145_v13 = vld [vmem:[%s1934_s1 + $0x24] sm:$0xf]  ;;  %v1527_v18 = vor.u32 %v1150_v2, %v1033_v4 }
  0x12   :  { %317 = vmatpush.bf16.msra.mxu3 %v1449_v50  ;;  %v1009_v14 = vld [vmem:[%s1934_s1 + $0x30] sm:$0xf0]  ;;  %v1015_v15 = vld [vmem:[%s1934_s1 + $0x28] sm:$0xf]  ;;  %v1148_v19 = vld [vmem:[%s1934_s1 + $0x34] sm:$0xf0] }
  0x14   :  { %279 = vmatpush.bf16.msra.mxu0 %v1467_v56 }
  0x15   :  { %292 = vmatpush.bf16.msra.mxu1 %v1471_v57  ;;  %305 = vmatpush.bf16.msra.mxu2 %v1473_v58 }
  0x16   :  { %318 = vmatpush.bf16.msra.mxu3 %v1485_v62 }
  0x17   :  { %7 = vsyncpa [#allocation5], 0  ;;  %v1146_v20 = vld [vmem:[%s1934_s1 + $0x2c] sm:$0xf]  ;;  %v1017_v22 = vld [vmem:[%s1934_s1 + $0x38] sm:$0xf0]  ;;  %v1539_v24 = vor.u32 %v1147_v9, %v1007_v6  ;;  %v1543_v26 = vor.u32 %v1145_v13, %v1009_v14  ;;  %v1545_v27 = vor.u32 %v1148_v19, %v1015_v15 }
  0x18   :  { %v1283_v23 = vmov 0   ;;  %280 = vmatpush.bf16.msra.mxu0 %v1503_v5  ;;  %v991_v28 = vld [vmem:[%s1934_s1] sm:$0xf]  ;;  %v1143_v30 = vld [vmem:[%s1934_s1 + $0xc] sm:$0xf0]  ;;  %v1557_v32 = vor.u32 %v1146_v20, %v1017_v22  ;;  %v100_v51 = vld [vmem:[%s1933_s0 + $0x8] sm:$0xff] }
  0x19   :  { %63 = vst [vmem:[#allocation2] sm:$0xf] %v1283_v23  ;;  %293 = vmatpush.bf16.msra.mxu1 %v1513_v10  ;;  %306 = vmatpush.bf16.msra.mxu2 %v1515_v11  ;;  %v1141_v31 = vld [vmem:[%s1934_s1 + $0x4] sm:$0xf]  ;;  %v993_v35 = vld [vmem:[%s1934_s1 + $0x10] sm:$0xf0]  ;;  %v1575_v41 = vor.u32 %v1143_v30, %v991_v28 }
  0x1a   :  { %319 = vmatpush.bf16.msra.mxu3 %v1527_v18  ;;  %v999_v36 = vld [vmem:[%s1934_s1 + $0x8] sm:$0xf]  ;;  %v1144_v37 = vld [vmem:[%s1934_s1 + $0x14] sm:$0xf0]  ;;  %v1142_v39 = vld [vmem:[%s1934_s1 + $0xc] sm:$0xf]  ;;  %v1579_v42 = vor.u32 %v1141_v31, %v993_v35 }
  0x1b   :  { %v1001_v40 = vld [vmem:[%s1934_s1 + $0x18] sm:$0xf0]  ;;  %v1581_v43 = vor.u32 %v1144_v37, %v999_v36  ;;  %v99_v49 = vld [vmem:[%s1933_s0] sm:$0xff]  ;;  %v101_v61 = vld [vmem:[%s1933_s0 + $0x10] sm:$0xff]  ;;  %s964_s5 = sshll.u32 %s1935_s2, 4  ;;  %s1285_s6 = smov 128   ;;  %s965_s5 = int_to_ptr.hbm [resolvable:$true] %s964_s5 }
  0x1c   :  { %281 = vmatpush.bf16.msra.mxu0 %v1539_v24  ;;  %v1584_v47 = vor.u32 %v1142_v39, %v1001_v40  ;;  %v102_v63 = vld [vmem:[%s1933_s0 + $0x18] sm:$0xff]  ;;  %s1286_s7 = smov 8  }
  0x1d   :  { %294 = vmatpush.bf16.msra.mxu1 %v1543_v26  ;;  %307 = vmatpush.bf16.msra.mxu2 %v1545_v27 }
  0x1e   :  { %320 = vmatpush.bf16.msra.mxu3 %v1557_v32 }
  0x20   :  { %282 = vmatpush.bf16.msra.mxu0 %v1575_v41  ;;  %v97_v48 = vld [vmem:[#allocation2] sm:$0xf] }
  0x21   :  { %295 = vmatpush.bf16.msra.mxu1 %v1579_v42  ;;  %308 = vmatpush.bf16.msra.mxu2 %v1581_v43 }
  0x22   :  { %321 = vmatpush.bf16.msra.mxu3 %v1584_v47 }
  0x23   :  { %283 = vmatmul.bf16.vlgmr.msra.gmra.mxu0 %v97_v48 }
  0x24   :  { %364 = vmatpush.bf16.msrb.mxu0 %v1311_v3  ;;  %296 = vmatmul.bf16.vlgmr.msra.gmra.mxu1 %v97_v48 }
  0x25   :  { %377 = vmatpush.bf16.msrb.mxu1 %v1322_v7  ;;  %309 = vmatmul.bf16.vlgmr.msra.gmra.mxu2 %v97_v48 }
  0x26   :  { %322 = vmatmul.bf16.vlgmr.msra.gmra.mxu3 %v97_v48  ;;  %390 = vmatpush.bf16.msrb.mxu2 %v1324_v8 }
  0x27   :  { %403 = vmatpush.bf16.msrb.mxu3 %v1336_v12 }
  0x28   :  { %365 = vmatpush.bf16.msrb.mxu0 %v1349_v16 }
  0x29   :  { %378 = vmatpush.bf16.msrb.mxu1 %v1351_v17 }
  0x2a   :  { %391 = vmatpush.bf16.msrb.mxu2 %v1363_v21 }
  0x2b   :  { %404 = vmatpush.bf16.msrb.mxu3 %v1374_v25 }
  0x2c   :  { %366 = vmatpush.bf16.msrb.mxu0 %v1386_v29 }
  0x2d   :  { %379 = vmatpush.bf16.msrb.mxu1 %v1399_v33 }
  0x2e   :  { %392 = vmatpush.bf16.msrb.mxu2 %v1401_v34 }
  0x2f   :  { %405 = vmatpush.bf16.msrb.mxu3 %v1413_v38 }
  0x30   :  { %367 = vmatpush.bf16.msrb.mxu0 %v1431_v44 }
  0x31   :  { %380 = vmatpush.bf16.msrb.mxu1 %v1435_v45 }
  0x32   :  { %393 = vmatpush.bf16.msrb.mxu2 %v1437_v46 }
  0x33   :  { %406 = vmatpush.bf16.msrb.mxu3 %v1449_v50 }
  0x34   :  { %368 = vmatpush.bf16.msrb.mxu0 %v1467_v56 }
  0x35   :  { %381 = vmatpush.bf16.msrb.mxu1 %v1471_v57 }
  0x36   :  { %394 = vmatpush.bf16.msrb.mxu2 %v1473_v58 }
  0x37   :  { %407 = vmatpush.bf16.msrb.mxu3 %v1485_v62 }
  0x38   :  { %369 = vmatpush.bf16.msrb.mxu0 %v1503_v5 }
  0x39   :  { %382 = vmatpush.bf16.msrb.mxu1 %v1513_v10 }
  0x3a   :  { %395 = vmatpush.bf16.msrb.mxu2 %v1515_v11 }
  0x3b   :  { %408 = vmatpush.bf16.msrb.mxu3 %v1527_v18 }
  0x3c   :  { %370 = vmatpush.bf16.msrb.mxu0 %v1539_v24 }
  0x3d   :  { %383 = vmatpush.bf16.msrb.mxu1 %v1543_v26 }
  0x3e   :  { %396 = vmatpush.bf16.msrb.mxu2 %v1545_v27 }
  0x3f   :  { %409 = vmatpush.bf16.msrb.mxu3 %v1557_v32 }
  0x40   :  { %371 = vmatpush.bf16.msrb.mxu0 %v1575_v41 }
  0x41   :  { %384 = vmatpush.bf16.msrb.mxu1 %v1579_v42 }
  0x42   :  { %397 = vmatpush.bf16.msrb.mxu2 %v1581_v43 }
  0x43   :  { %410 = vmatpush.bf16.msrb.mxu3 %v1584_v47 }
  0x44   :  { %453 = vmatpush.bf16.msra.mxu0 %v1311_v3 }
  0x45   :  { %466 = vmatpush.bf16.msra.mxu1 %v1322_v7 }
  0x46   :  { %479 = vmatpush.bf16.msra.mxu2 %v1324_v8 }
  0x47   :  { %492 = vmatpush.bf16.msra.mxu3 %v1336_v12 }
  0x48   :  { %454 = vmatpush.bf16.msra.mxu0 %v1349_v16 }
  0x49   :  { %467 = vmatpush.bf16.msra.mxu1 %v1351_v17 }
  0x4a   :  { %480 = vmatpush.bf16.msra.mxu2 %v1363_v21 }
  0x4b   :  { %493 = vmatpush.bf16.msra.mxu3 %v1374_v25 }
  0x4c   :  { %455 = vmatpush.bf16.msra.mxu0 %v1386_v29 }
  0x4d   :  { %468 = vmatpush.bf16.msra.mxu1 %v1399_v33 }
  0x4e   :  { %481 = vmatpush.bf16.msra.mxu2 %v1401_v34 }
  0x4f   :  { %494 = vmatpush.bf16.msra.mxu3 %v1413_v38 }
  0x50   :  { %456 = vmatpush.bf16.msra.mxu0 %v1431_v44 }
  0x51   :  { %469 = vmatpush.bf16.msra.mxu1 %v1435_v45 }
  0x52   :  { %482 = vmatpush.bf16.msra.mxu2 %v1437_v46 }
  0x53   :  { %495 = vmatpush.bf16.msra.mxu3 %v1449_v50 }
  0x54   :  { %457 = vmatpush.bf16.msra.mxu0 %v1467_v56 }
  0x55   :  { %470 = vmatpush.bf16.msra.mxu1 %v1471_v57 }
  0x56   :  { %483 = vmatpush.bf16.msra.mxu2 %v1473_v58 }
  0x57   :  { %496 = vmatpush.bf16.msra.mxu3 %v1485_v62 }
  0x58   :  { %458 = vmatpush.bf16.msra.mxu0 %v1503_v5 }
  0x59   :  { %471 = vmatpush.bf16.msra.mxu1 %v1513_v10 }
  0x5a   :  { %484 = vmatpush.bf16.msra.mxu2 %v1515_v11 }
  0x5b   :  { %497 = vmatpush.bf16.msra.mxu3 %v1527_v18 }
  0x5c   :  { %459 = vmatpush.bf16.msra.mxu0 %v1539_v24 }
  0x5d   :  { %472 = vmatpush.bf16.msra.mxu1 %v1543_v26 }
  0x5e   :  { %485 = vmatpush.bf16.msra.mxu2 %v1545_v27 }
  0x5f   :  { %498 = vmatpush.bf16.msra.mxu3 %v1557_v32 }
  0x60   :  { %460 = vmatpush.bf16.msra.mxu0 %v1575_v41 }
  0x61   :  { %473 = vmatpush.bf16.msra.mxu1 %v1579_v42 }
  0x62   :  { %486 = vmatpush.bf16.msra.mxu2 %v1581_v43 }
  0x63   :  { %499 = vmatpush.bf16.msra.mxu3 %v1584_v47 }
  0xa0   :  { %v284_v52 = vpop.f32.mrf.mxu0 }
  0xa1   :  { %v327_v53 = vadd.f32 %v284_v52, %v99_v49  ;;  %v297_v54 = vpop.f32.mrf.mxu1 }
  0xa2   :  { %v328_v55 = vadd.f32 %v297_v54, %v100_v51  ;;  %v1118_v54 = vld [vmem:[%s1933_s0 + $0x28] sm:$0xff] }
  0xa3   :  { %v331_v59 = vmul.f32 0.5, %v327_v53  ;;  %v1117_v53 = vld [vmem:[%s1933_s0 + $0x20] sm:$0xff] }
  0xa4   :  { %v335_v60 = vmul.f32 0.5, %v328_v55 }
  0xa5   :  { %1177 = vtanh.f32 %v331_v59 }
  0xa6   :  { %1179 = vtanh.f32 %v335_v60 }
  0xa8   :  { %v310_v0 = vpop.f32.mrf.mxu2  ;;  %v286_v4 = vpop.f32.mrf.mxu0 }
  0xa9   :  { %v329_v1 = vadd.f32 %v310_v0, %v101_v61  ;;  %v323_v2 = vpop.f32.mrf.mxu3  ;;  %v299_v9 = vpop.f32.mrf.mxu1 }
  0xaa   :  { %v330_v6 = vadd.f32 %v323_v2, %v102_v63  ;;  %v1120_v2 = vld [vmem:[%s1933_s0 + $0x38] sm:$0xff] }
  0xab   :  { %1181 = vtanh.f32 %v329_v1  ;;  %v1178_v13 = vpop.eup %1177  ;;  %v1119_v1 = vld [vmem:[%s1933_s0 + $0x30] sm:$0xff] }
  0xac   :  { %v340_v14 = vmul.f32 0.5, %v330_v6  ;;  %v1180_v15 = vpop.eup %1179  ;;  %v333_v19 = vmul.f32 0.5, %v1178_v13 }
  0xad   :  { %v337_v20 = vmul.f32 0.5, %v1180_v15 }
  0xae   :  { %1183 = vtanh.f32 %v340_v14  ;;  %v334_v22 = vadd.f32 0.5, %v333_v19 }
  0xaf   :  { %v338_v23 = vadd.f32 0.5, %v337_v20 }
  0xb0   :  { %v312_v28 = vpop.f32.mrf.mxu2 }
  0xb1   :  { %v1182_v30 = vpop.eup %1181  ;;  %v325_v31 = vpop.f32.mrf.mxu3  ;;  %v344_v35 = vmul.f32 0.0, %v338_v23 }
  0xb2   :  { %v345_v36 = vmul.f32 %v1182_v30, %v334_v22 }
  0xb4   :  { %v1184_v37 = vpop.eup %1183  ;;  %v1666_v39 = vadd.f32 %v345_v36, %v344_v35 }
  0xb5   :  { %v342_v40 = vmul.f32 0.5, %v1184_v37 }
  0xb6   :  { %1185 = vtanh.f32 %v1666_v39 }
  0xb7   :  { %v343_v48 = vadd.f32 0.5, %v342_v40 }
  0xbc   :  { %v1186_v49 = vpop.eup %1185 }
  0xbd   :  { %v348_v51 = vmul.f32 %v1186_v49, %v343_v48 }
  0xbf   :  { %943 = vst [vmem:[#allocation4] sm:$0xff] %v348_v51  ;;  %v349_v52 = vpack.c.bf16 %v348_v51, %v348_v51 }
  0xc1   :  { %372 = vmatmul.bf16.vlgmr.msrb.gmra.mxu0 %v349_v52  ;;  %385 = vmatmul.bf16.vlgmr.msrb.gmra.mxu1 %v349_v52 }
  0xc2   :  { %398 = vmatmul.bf16.vlgmr.msrb.gmra.mxu2 %v349_v52  ;;  %411 = vmatmul.bf16.vlgmr.msrb.gmra.mxu3 %v349_v52 }
  0xc3   :  { %542 = vmatpush.bf16.msrb.mxu0 %v1311_v3  ;;  %555 = vmatpush.bf16.msrb.mxu1 %v1322_v7 }
  0xc4   :  { %568 = vmatpush.bf16.msrb.mxu2 %v1324_v8  ;;  %581 = vmatpush.bf16.msrb.mxu3 %v1336_v12 }
  0xc7   :  { %543 = vmatpush.bf16.msrb.mxu0 %v1349_v16  ;;  %556 = vmatpush.bf16.msrb.mxu1 %v1351_v17 }
  0xc8   :  { %569 = vmatpush.bf16.msrb.mxu2 %v1363_v21  ;;  %582 = vmatpush.bf16.msrb.mxu3 %v1374_v25 }
  0xcb   :  { %544 = vmatpush.bf16.msrb.mxu0 %v1386_v29  ;;  %557 = vmatpush.bf16.msrb.mxu1 %v1399_v33 }
  0xcc   :  { %570 = vmatpush.bf16.msrb.mxu2 %v1401_v34  ;;  %583 = vmatpush.bf16.msrb.mxu3 %v1413_v38 }
  0xcf   :  { %545 = vmatpush.bf16.msrb.mxu0 %v1431_v44  ;;  %558 = vmatpush.bf16.msrb.mxu1 %v1435_v45 }
  0xd0   :  { %571 = vmatpush.bf16.msrb.mxu2 %v1437_v46  ;;  %584 = vmatpush.bf16.msrb.mxu3 %v1449_v50 }
  0xd3   :  { %546 = vmatpush.bf16.msrb.mxu0 %v1467_v56  ;;  %559 = vmatpush.bf16.msrb.mxu1 %v1471_v57 }
  0xd4   :  { %572 = vmatpush.bf16.msrb.mxu2 %v1473_v58  ;;  %585 = vmatpush.bf16.msrb.mxu3 %v1485_v62 }
  0xd7   :  { %547 = vmatpush.bf16.msrb.mxu0 %v1503_v5  ;;  %560 = vmatpush.bf16.msrb.mxu1 %v1513_v10 }
  0xd8   :  { %573 = vmatpush.bf16.msrb.mxu2 %v1515_v11  ;;  %586 = vmatpush.bf16.msrb.mxu3 %v1527_v18 }
  0xdb   :  { %548 = vmatpush.bf16.msrb.mxu0 %v1539_v24  ;;  %561 = vmatpush.bf16.msrb.mxu1 %v1543_v26 }
  0xdc   :  { %574 = vmatpush.bf16.msrb.mxu2 %v1545_v27  ;;  %587 = vmatpush.bf16.msrb.mxu3 %v1557_v32 }
  0xdf   :  { %549 = vmatpush.bf16.msrb.mxu0 %v1575_v41  ;;  %562 = vmatpush.bf16.msrb.mxu1 %v1579_v42 }
  0xe0   :  { %575 = vmatpush.bf16.msrb.mxu2 %v1581_v43  ;;  %588 = vmatpush.bf16.msrb.mxu3 %v1584_v47 }
 0x13e   :  { %v373_v55 = vpop.f32.mrf.mxu0  ;;  %v386_v59 = vpop.f32.mrf.mxu1 }
 0x13f   :  { %v416_v60 = vadd.f32 %v1117_v53, %v373_v55  ;;  %v417_v61 = vadd.f32 %v1118_v54, %v386_v59 }
 0x141   :  { %v420_v63 = vmul.f32 0.5, %v416_v60  ;;  %v424_v0 = vmul.f32 0.5, %v417_v61  ;;  %v1126_v60 = vld [vmem:[%s1933_s0 + $0x48] sm:$0xff] }
 0x143   :  { %1187 = vtanh.f32 %v420_v63 }
 0x144   :  { %1189 = vtanh.f32 %v424_v0 }
 0x145   :  { %v399_v4 = vpop.f32.mrf.mxu2  ;;  %v412_v6 = vpop.f32.mrf.mxu3 }
 0x146   :  { %v418_v9 = vadd.f32 %v1119_v1, %v399_v4  ;;  %v419_v13 = vadd.f32 %v1120_v2, %v412_v6  ;;  %v375_v14 = vpop.f32.mrf.mxu0  ;;  %v388_v15 = vpop.f32.mrf.mxu1  ;;  %v1127_v6 = vld [vmem:[%s1933_s0 + $0x50] sm:$0xff] }
 0x148   :  { %1191 = vtanh.f32 %v418_v9  ;;  %v429_v19 = vmul.f32 0.5, %v419_v13  ;;  %v1128_v9 = vld [vmem:[%s1933_s0 + $0x58] sm:$0xff] }
 0x149   :  { %v1188_v20 = vpop.eup %1187 }
 0x14a   :  { %v1190_v22 = vpop.eup %1189  ;;  %v422_v23 = vmul.f32 0.5, %v1188_v20  ;;  %1193 = vtanh.f32 %v429_v19 }
 0x14b   :  { %v426_v28 = vmul.f32 0.5, %v1190_v22 }
 0x14c   :  { %v423_v30 = vadd.f32 0.5, %v422_v23 }
 0x14d   :  { %v427_v31 = vadd.f32 0.5, %v426_v28  ;;  %v401_v35 = vpop.f32.mrf.mxu2  ;;  %v414_v36 = vpop.f32.mrf.mxu3 }
 0x14e   :  { %v1192_v37 = vpop.eup %1191 }
 0x14f   :  { %v433_v40 = vmul.f32 %v427_v31, %v1666_v39  ;;  %v434_v48 = vmul.f32 %v1192_v37, %v423_v30  ;;  %v1125_v39 = vld [vmem:[%s1933_s0 + $0x40] sm:$0xff] }
 0x150   :  { %v1194_v49 = vpop.eup %1193 }
 0x151   :  { %v1714_v51 = vadd.f32 %v434_v48, %v433_v40  ;;  %v431_v52 = vmul.f32 0.5, %v1194_v49 }
 0x153   :  { %1195 = vtanh.f32 %v1714_v51  ;;  %v432_v53 = vadd.f32 0.5, %v431_v52 }
 0x159   :  { %v1196_v54 = vpop.eup %1195 }
 0x15a   :  { %v437_v55 = vmul.f32 %v1196_v54, %v432_v53 }
 0x15c   :  { %944 = vst [vmem:[#allocation4 + $0x8] sm:$0xff] %v437_v55  ;;  %v438_v59 = vpack.c.bf16 %v437_v55, %v437_v55 }
 0x15e   :  { %461 = vmatmul.bf16.vlgmr.msra.gmra.mxu0 %v438_v59  ;;  %474 = vmatmul.bf16.vlgmr.msra.gmra.mxu1 %v438_v59 }
 0x15f   :  { %487 = vmatmul.bf16.vlgmr.msra.gmra.mxu2 %v438_v59  ;;  %500 = vmatmul.bf16.vlgmr.msra.gmra.mxu3 %v438_v59 }
 0x160   :  { %621 = vmatpush.bf16.msra.mxu0 %v1311_v3  ;;  %634 = vmatpush.bf16.msra.mxu1 %v1322_v7 }
 0x161   :  { %647 = vmatpush.bf16.msra.mxu2 %v1324_v8  ;;  %660 = vmatpush.bf16.msra.mxu3 %v1336_v12 }
 0x164   :  { %622 = vmatpush.bf16.msra.mxu0 %v1349_v16  ;;  %635 = vmatpush.bf16.msra.mxu1 %v1351_v17 }
 0x165   :  { %648 = vmatpush.bf16.msra.mxu2 %v1363_v21  ;;  %661 = vmatpush.bf16.msra.mxu3 %v1374_v25 }
 0x168   :  { %623 = vmatpush.bf16.msra.mxu0 %v1386_v29  ;;  %636 = vmatpush.bf16.msra.mxu1 %v1399_v33 }
 0x169   :  { %649 = vmatpush.bf16.msra.mxu2 %v1401_v34  ;;  %662 = vmatpush.bf16.msra.mxu3 %v1413_v38 }
 0x16c   :  { %624 = vmatpush.bf16.msra.mxu0 %v1431_v44  ;;  %637 = vmatpush.bf16.msra.mxu1 %v1435_v45 }
 0x16d   :  { %650 = vmatpush.bf16.msra.mxu2 %v1437_v46  ;;  %663 = vmatpush.bf16.msra.mxu3 %v1449_v50 }
 0x170   :  { %625 = vmatpush.bf16.msra.mxu0 %v1467_v56  ;;  %638 = vmatpush.bf16.msra.mxu1 %v1471_v57 }
 0x171   :  { %651 = vmatpush.bf16.msra.mxu2 %v1473_v58  ;;  %664 = vmatpush.bf16.msra.mxu3 %v1485_v62 }
 0x174   :  { %626 = vmatpush.bf16.msra.mxu0 %v1503_v5  ;;  %639 = vmatpush.bf16.msra.mxu1 %v1513_v10 }
 0x175   :  { %652 = vmatpush.bf16.msra.mxu2 %v1515_v11  ;;  %665 = vmatpush.bf16.msra.mxu3 %v1527_v18 }
 0x178   :  { %627 = vmatpush.bf16.msra.mxu0 %v1539_v24  ;;  %640 = vmatpush.bf16.msra.mxu1 %v1543_v26 }
 0x179   :  { %653 = vmatpush.bf16.msra.mxu2 %v1545_v27  ;;  %666 = vmatpush.bf16.msra.mxu3 %v1557_v32 }
 0x17c   :  { %628 = vmatpush.bf16.msra.mxu0 %v1575_v41  ;;  %641 = vmatpush.bf16.msra.mxu1 %v1579_v42 }
 0x17d   :  { %654 = vmatpush.bf16.msra.mxu2 %v1581_v43  ;;  %667 = vmatpush.bf16.msra.mxu3 %v1584_v47 }
 0x1db   :  { %v462_v61 = vpop.f32.mrf.mxu0  ;;  %v475_v63 = vpop.f32.mrf.mxu1 }
 0x1dc   :  { %v505_v0 = vadd.f32 %v1125_v39, %v462_v61  ;;  %v506_v1 = vadd.f32 %v1126_v60, %v475_v63 }
 0x1de   :  { %v509_v2 = vmul.f32 0.5, %v505_v0  ;;  %v513_v4 = vmul.f32 0.5, %v506_v1  ;;  %v1134_v0 = vld [vmem:[%s1933_s0 + $0x68] sm:$0xff] }
 0x1e0   :  { %1197 = vtanh.f32 %v509_v2 }
 0x1e1   :  { %1199 = vtanh.f32 %v513_v4 }
 0x1e2   :  { %v488_v13 = vpop.f32.mrf.mxu2  ;;  %v501_v14 = vpop.f32.mrf.mxu3 }
 0x1e3   :  { %v507_v15 = vadd.f32 %v1127_v6, %v488_v13  ;;  %v508_v19 = vadd.f32 %v1128_v9, %v501_v14  ;;  %v464_v20 = vpop.f32.mrf.mxu0  ;;  %v477_v22 = vpop.f32.mrf.mxu1  ;;  %v1135_v14 = vld [vmem:[%s1933_s0 + $0x70] sm:$0xff] }
 0x1e5   :  { %1201 = vtanh.f32 %v507_v15  ;;  %v518_v23 = vmul.f32 0.5, %v508_v19  ;;  %v1136_v15 = vld [vmem:[%s1933_s0 + $0x78] sm:$0xff] }
 0x1e6   :  { %v1198_v28 = vpop.eup %1197 }
 0x1e7   :  { %v1200_v30 = vpop.eup %1199  ;;  %v511_v31 = vmul.f32 0.5, %v1198_v28  ;;  %1203 = vtanh.f32 %v518_v23 }
 0x1e8   :  { %v515_v35 = vmul.f32 0.5, %v1200_v30 }
 0x1e9   :  { %v512_v36 = vadd.f32 0.5, %v511_v31 }
 0x1ea   :  { %v516_v37 = vadd.f32 0.5, %v515_v35  ;;  %v490_v40 = vpop.f32.mrf.mxu2  ;;  %v503_v48 = vpop.f32.mrf.mxu3 }
 0x1eb   :  { %v1202_v49 = vpop.eup %1201 }
 0x1ec   :  { %v522_v52 = vmul.f32 %v516_v37, %v1714_v51  ;;  %v523_v53 = vmul.f32 %v1202_v49, %v512_v36  ;;  %v1133_v51 = vld [vmem:[%s1933_s0 + $0x60] sm:$0xff] }
 0x1ed   :  { %v1204_v54 = vpop.eup %1203 }
 0x1ee   :  { %v1762_v55 = vadd.f32 %v523_v53, %v522_v52  ;;  %v520_v59 = vmul.f32 0.5, %v1204_v54 }
 0x1f0   :  { %1205 = vtanh.f32 %v1762_v55  ;;  %v521_v39 = vadd.f32 0.5, %v520_v59 }
 0x1f6   :  { %v1206_v60 = vpop.eup %1205 }
 0x1f7   :  { %v526_v61 = vmul.f32 %v1206_v60, %v521_v39 }
 0x1f9   :  { %945 = vst [vmem:[#allocation4 + $0x10] sm:$0xff] %v526_v61  ;;  %v527_v63 = vpack.c.bf16 %v526_v61, %v526_v61 }
 0x1fb   :  { %550 = vmatmul.bf16.vlgmr.msrb.gmra.mxu0 %v527_v63  ;;  %563 = vmatmul.bf16.vlgmr.msrb.gmra.mxu1 %v527_v63 }
 0x1fc   :  { %576 = vmatmul.bf16.vlgmr.msrb.gmra.mxu2 %v527_v63  ;;  %589 = vmatmul.bf16.vlgmr.msrb.gmra.mxu3 %v527_v63 }
 0x1fd   :  { %700 = vmatpush.bf16.msrb.mxu0 %v1311_v3  ;;  %713 = vmatpush.bf16.msrb.mxu1 %v1322_v7 }
 0x1fe   :  { %726 = vmatpush.bf16.msrb.mxu2 %v1324_v8  ;;  %739 = vmatpush.bf16.msrb.mxu3 %v1336_v12 }
 0x201   :  { %701 = vmatpush.bf16.msrb.mxu0 %v1349_v16  ;;  %714 = vmatpush.bf16.msrb.mxu1 %v1351_v17 }
 0x202   :  { %727 = vmatpush.bf16.msrb.mxu2 %v1363_v21  ;;  %740 = vmatpush.bf16.msrb.mxu3 %v1374_v25 }
 0x205   :  { %702 = vmatpush.bf16.msrb.mxu0 %v1386_v29  ;;  %715 = vmatpush.bf16.msrb.mxu1 %v1399_v33 }
 0x206   :  { %728 = vmatpush.bf16.msrb.mxu2 %v1401_v34  ;;  %741 = vmatpush.bf16.msrb.mxu3 %v1413_v38 }
 0x209   :  { %703 = vmatpush.bf16.msrb.mxu0 %v1431_v44  ;;  %716 = vmatpush.bf16.msrb.mxu1 %v1435_v45 }
 0x20a   :  { %729 = vmatpush.bf16.msrb.mxu2 %v1437_v46  ;;  %742 = vmatpush.bf16.msrb.mxu3 %v1449_v50 }
 0x20d   :  { %704 = vmatpush.bf16.msrb.mxu0 %v1467_v56  ;;  %717 = vmatpush.bf16.msrb.mxu1 %v1471_v57 }
 0x20e   :  { %730 = vmatpush.bf16.msrb.mxu2 %v1473_v58  ;;  %743 = vmatpush.bf16.msrb.mxu3 %v1485_v62 }
 0x211   :  { %705 = vmatpush.bf16.msrb.mxu0 %v1503_v5  ;;  %718 = vmatpush.bf16.msrb.mxu1 %v1513_v10 }
 0x212   :  { %731 = vmatpush.bf16.msrb.mxu2 %v1515_v11  ;;  %744 = vmatpush.bf16.msrb.mxu3 %v1527_v18 }
 0x215   :  { %706 = vmatpush.bf16.msrb.mxu0 %v1539_v24  ;;  %719 = vmatpush.bf16.msrb.mxu1 %v1543_v26 }
 0x216   :  { %732 = vmatpush.bf16.msrb.mxu2 %v1545_v27  ;;  %745 = vmatpush.bf16.msrb.mxu3 %v1557_v32 }
 0x219   :  { %707 = vmatpush.bf16.msrb.mxu0 %v1575_v41  ;;  %720 = vmatpush.bf16.msrb.mxu1 %v1579_v42 }
 0x21a   :  { %733 = vmatpush.bf16.msrb.mxu2 %v1581_v43  ;;  %746 = vmatpush.bf16.msrb.mxu3 %v1584_v47 }
 0x278   :  { %v551_v1 = vpop.f32.mrf.mxu0  ;;  %v564_v2 = vpop.f32.mrf.mxu1 }
 0x279   :  { %v594_v4 = vadd.f32 %v1133_v51, %v551_v1  ;;  %v595_v6 = vadd.f32 %v1134_v0, %v564_v2 }
 0x27b   :  { %v598_v9 = vmul.f32 0.5, %v594_v4  ;;  %v602_v13 = vmul.f32 0.5, %v595_v6  ;;  %v1138_v4 = vld [vmem:[%s1933_s0 + $0x88] sm:$0xff] }
 0x27d   :  { %1207 = vtanh.f32 %v598_v9 }
 0x27e   :  { %1209 = vtanh.f32 %v602_v13 }
 0x27f   :  { %v577_v19 = vpop.f32.mrf.mxu2  ;;  %v590_v20 = vpop.f32.mrf.mxu3 }
 0x280   :  { %v596_v22 = vadd.f32 %v1135_v14, %v577_v19  ;;  %v597_v23 = vadd.f32 %v1136_v15, %v590_v20  ;;  %v553_v28 = vpop.f32.mrf.mxu0  ;;  %v566_v30 = vpop.f32.mrf.mxu1  ;;  %v1139_v20 = vld [vmem:[%s1933_s0 + $0x90] sm:$0xff] }
 0x282   :  { %1211 = vtanh.f32 %v596_v22  ;;  %v607_v31 = vmul.f32 0.5, %v597_v23  ;;  %v1140_v22 = vld [vmem:[%s1933_s0 + $0x98] sm:$0xff] }
 0x283   :  { %v1208_v35 = vpop.eup %1207 }
 0x284   :  { %v1210_v36 = vpop.eup %1209  ;;  %v600_v37 = vmul.f32 0.5, %v1208_v35  ;;  %1213 = vtanh.f32 %v607_v31 }
 0x285   :  { %v604_v40 = vmul.f32 0.5, %v1210_v36 }
 0x286   :  { %v601_v48 = vadd.f32 0.5, %v600_v37 }
 0x287   :  { %v605_v49 = vadd.f32 0.5, %v604_v40  ;;  %v579_v52 = vpop.f32.mrf.mxu2  ;;  %v592_v53 = vpop.f32.mrf.mxu3 }
 0x288   :  { %v1212_v54 = vpop.eup %1211 }
 0x289   :  { %v611_v59 = vmul.f32 %v605_v49, %v1762_v55  ;;  %v612_v39 = vmul.f32 %v1212_v54, %v601_v48  ;;  %v1137_v55 = vld [vmem:[%s1933_s0 + $0x80] sm:$0xff] }
 0x28a   :  { %v1214_v60 = vpop.eup %1213 }
 0x28b   :  { %v1810_v61 = vadd.f32 %v612_v39, %v611_v59  ;;  %v609_v63 = vmul.f32 0.5, %v1214_v60 }
 0x28d   :  { %1215 = vtanh.f32 %v1810_v61  ;;  %v610_v51 = vadd.f32 0.5, %v609_v63 }
 0x293   :  { %v1216_v0 = vpop.eup %1215 }
 0x294   :  { %v615_v1 = vmul.f32 %v1216_v0, %v610_v51 }
 0x296   :  { %946 = vst [vmem:[#allocation4 + $0x18] sm:$0xff] %v615_v1  ;;  %v616_v2 = vpack.c.bf16 %v615_v1, %v615_v1 }
 0x298   :  { %629 = vmatmul.bf16.vlgmr.msra.gmra.mxu0 %v616_v2  ;;  %642 = vmatmul.bf16.vlgmr.msra.gmra.mxu1 %v616_v2 }
 0x299   :  { %655 = vmatmul.bf16.vlgmr.msra.gmra.mxu2 %v616_v2  ;;  %668 = vmatmul.bf16.vlgmr.msra.gmra.mxu3 %v616_v2 }
 0x29a   :  { %779 = vmatpush.bf16.msra.mxu0 %v1311_v3  ;;  %792 = vmatpush.bf16.msra.mxu1 %v1322_v7 }
 0x29b   :  { %805 = vmatpush.bf16.msra.mxu2 %v1324_v8  ;;  %818 = vmatpush.bf16.msra.mxu3 %v1336_v12 }
 0x29e   :  { %780 = vmatpush.bf16.msra.mxu0 %v1349_v16  ;;  %793 = vmatpush.bf16.msra.mxu1 %v1351_v17 }
 0x29f   :  { %806 = vmatpush.bf16.msra.mxu2 %v1363_v21  ;;  %819 = vmatpush.bf16.msra.mxu3 %v1374_v25 }
 0x2a2   :  { %781 = vmatpush.bf16.msra.mxu0 %v1386_v29  ;;  %794 = vmatpush.bf16.msra.mxu1 %v1399_v33 }
 0x2a3   :  { %807 = vmatpush.bf16.msra.mxu2 %v1401_v34  ;;  %820 = vmatpush.bf16.msra.mxu3 %v1413_v38 }
 0x2a6   :  { %782 = vmatpush.bf16.msra.mxu0 %v1431_v44  ;;  %795 = vmatpush.bf16.msra.mxu1 %v1435_v45 }
 0x2a7   :  { %808 = vmatpush.bf16.msra.mxu2 %v1437_v46  ;;  %821 = vmatpush.bf16.msra.mxu3 %v1449_v50 }
 0x2aa   :  { %783 = vmatpush.bf16.msra.mxu0 %v1467_v56  ;;  %796 = vmatpush.bf16.msra.mxu1 %v1471_v57 }
 0x2ab   :  { %809 = vmatpush.bf16.msra.mxu2 %v1473_v58  ;;  %822 = vmatpush.bf16.msra.mxu3 %v1485_v62 }
 0x2ae   :  { %784 = vmatpush.bf16.msra.mxu0 %v1503_v5  ;;  %797 = vmatpush.bf16.msra.mxu1 %v1513_v10 }
 0x2af   :  { %810 = vmatpush.bf16.msra.mxu2 %v1515_v11  ;;  %823 = vmatpush.bf16.msra.mxu3 %v1527_v18 }
 0x2b2   :  { %785 = vmatpush.bf16.msra.mxu0 %v1539_v24  ;;  %798 = vmatpush.bf16.msra.mxu1 %v1543_v26 }
 0x2b3   :  { %811 = vmatpush.bf16.msra.mxu2 %v1545_v27  ;;  %824 = vmatpush.bf16.msra.mxu3 %v1557_v32 }
 0x2b6   :  { %786 = vmatpush.bf16.msra.mxu0 %v1575_v41  ;;  %799 = vmatpush.bf16.msra.mxu1 %v1579_v42 }
 0x2b7   :  { %812 = vmatpush.bf16.msra.mxu2 %v1581_v43  ;;  %825 = vmatpush.bf16.msra.mxu3 %v1584_v47 }
 0x315   :  { %v630_v6 = vpop.f32.mrf.mxu0  ;;  %v643_v9 = vpop.f32.mrf.mxu1 }
 0x316   :  { %v673_v13 = vadd.f32 %v1137_v55, %v630_v6  ;;  %v674_v14 = vadd.f32 %v1138_v4, %v643_v9 }
 0x318   :  { %v677_v15 = vmul.f32 0.5, %v673_v13  ;;  %v681_v19 = vmul.f32 0.5, %v674_v14 }
 0x31a   :  { %1217 = vtanh.f32 %v677_v15  ;;  %v1121_v15 = vld [vmem:[%s1933_s0 + $0xc0] sm:$0xff] }
 0x31b   :  { %1219 = vtanh.f32 %v681_v19  ;;  %v1122_v19 = vld [vmem:[%s1933_s0 + $0xc8] sm:$0xff] }
 0x31c   :  { %v656_v23 = vpop.f32.mrf.mxu2  ;;  %v669_v28 = vpop.f32.mrf.mxu3 }
 0x31d   :  { %v675_v30 = vadd.f32 %v1139_v20, %v656_v23  ;;  %v676_v31 = vadd.f32 %v1140_v22, %v669_v28  ;;  %v632_v35 = vpop.f32.mrf.mxu0  ;;  %v645_v36 = vpop.f32.mrf.mxu1 }
 0x31e   :  { %v1123_v35 = vld [vmem:[%s1933_s0 + $0xd0] sm:$0xff]  ;;  %v1124_v36 = vld [vmem:[%s1933_s0 + $0xd8] sm:$0xff] }
 0x31f   :  { %1221 = vtanh.f32 %v675_v30  ;;  %v686_v37 = vmul.f32 0.5, %v676_v31 }
 0x320   :  { %v1218_v40 = vpop.eup %1217 }
 0x321   :  { %v1220_v48 = vpop.eup %1219  ;;  %v679_v49 = vmul.f32 0.5, %v1218_v40  ;;  %1223 = vtanh.f32 %v686_v37 }
 0x322   :  { %v683_v52 = vmul.f32 0.5, %v1220_v48 }
 0x323   :  { %v680_v53 = vadd.f32 0.5, %v679_v49 }
 0x324   :  { %v684_v54 = vadd.f32 0.5, %v683_v52  ;;  %v658_v59 = vpop.f32.mrf.mxu2  ;;  %v671_v39 = vpop.f32.mrf.mxu3 }
 0x325   :  { %v1222_v60 = vpop.eup %1221 }
 0x326   :  { %v690_v63 = vmul.f32 %v684_v54, %v1810_v61  ;;  %v691_v51 = vmul.f32 %v1222_v60, %v680_v53 }
 0x327   :  { %v1224_v0 = vpop.eup %1223 }
 0x328   :  { %v1858_v1 = vadd.f32 %v691_v51, %v690_v63  ;;  %v688_v2 = vmul.f32 0.5, %v1224_v0 }
 0x32a   :  { %1225 = vtanh.f32 %v1858_v1  ;;  %v689_v55 = vadd.f32 0.5, %v688_v2 }
 0x330   :  { %v1226_v4 = vpop.eup %1225 }
 0x331   :  { %v694_v6 = vmul.f32 %v1226_v4, %v689_v55 }
 0x333   :  { %947 = vst [vmem:[#allocation4 + $0x20] sm:$0xff] %v694_v6  ;;  %v695_v9 = vpack.c.bf16 %v694_v6, %v694_v6 }
 0x335   :  { %708 = vmatmul.bf16.vlgmr.msrb.gmra.mxu0 %v695_v9  ;;  %721 = vmatmul.bf16.vlgmr.msrb.gmra.mxu1 %v695_v9 }
 0x336   :  { %734 = vmatmul.bf16.vlgmr.msrb.gmra.mxu2 %v695_v9  ;;  %747 = vmatmul.bf16.vlgmr.msrb.gmra.mxu3 %v695_v9 }
 0x337   :  { %858 = vmatpush.bf16.msrb.mxu0 %v1311_v3  ;;  %871 = vmatpush.bf16.msrb.mxu1 %v1322_v7  ;;  %v1129_v3 = vld [vmem:[%s1933_s0 + $0xa0] sm:$0xff]  ;;  %v1130_v7 = vld [vmem:[%s1933_s0 + $0xa8] sm:$0xff] }
 0x338   :  { %884 = vmatpush.bf16.msrb.mxu2 %v1324_v8  ;;  %897 = vmatpush.bf16.msrb.mxu3 %v1336_v12 }
 0x33b   :  { %859 = vmatpush.bf16.msrb.mxu0 %v1349_v16  ;;  %872 = vmatpush.bf16.msrb.mxu1 %v1351_v17 }
 0x33c   :  { %885 = vmatpush.bf16.msrb.mxu2 %v1363_v21  ;;  %898 = vmatpush.bf16.msrb.mxu3 %v1374_v25 }
 0x33f   :  { %860 = vmatpush.bf16.msrb.mxu0 %v1386_v29  ;;  %873 = vmatpush.bf16.msrb.mxu1 %v1399_v33  ;;  %v1131_v29 = vld [vmem:[%s1933_s0 + $0xb0] sm:$0xff]  ;;  %v1132_v33 = vld [vmem:[%s1933_s0 + $0xb8] sm:$0xff] }
 0x340   :  { %886 = vmatpush.bf16.msrb.mxu2 %v1401_v34  ;;  %899 = vmatpush.bf16.msrb.mxu3 %v1413_v38 }
 0x343   :  { %861 = vmatpush.bf16.msrb.mxu0 %v1431_v44  ;;  %874 = vmatpush.bf16.msrb.mxu1 %v1435_v45 }
 0x344   :  { %887 = vmatpush.bf16.msrb.mxu2 %v1437_v46  ;;  %900 = vmatpush.bf16.msrb.mxu3 %v1449_v50 }
 0x347   :  { %862 = vmatpush.bf16.msrb.mxu0 %v1467_v56  ;;  %875 = vmatpush.bf16.msrb.mxu1 %v1471_v57 }
 0x348   :  { %888 = vmatpush.bf16.msrb.mxu2 %v1473_v58  ;;  %901 = vmatpush.bf16.msrb.mxu3 %v1485_v62 }
 0x34b   :  { %863 = vmatpush.bf16.msrb.mxu0 %v1503_v5  ;;  %876 = vmatpush.bf16.msrb.mxu1 %v1513_v10 }
 0x34c   :  { %889 = vmatpush.bf16.msrb.mxu2 %v1515_v11  ;;  %902 = vmatpush.bf16.msrb.mxu3 %v1527_v18 }
 0x34f   :  { %864 = vmatpush.bf16.msrb.mxu0 %v1539_v24  ;;  %877 = vmatpush.bf16.msrb.mxu1 %v1543_v26 }
 0x350   :  { %890 = vmatpush.bf16.msrb.mxu2 %v1545_v27  ;;  %903 = vmatpush.bf16.msrb.mxu3 %v1557_v32 }
 0x353   :  { %865 = vmatpush.bf16.msrb.mxu0 %v1575_v41  ;;  %878 = vmatpush.bf16.msrb.mxu1 %v1579_v42 }
 0x354   :  { %891 = vmatpush.bf16.msrb.mxu2 %v1581_v43  ;;  %904 = vmatpush.bf16.msrb.mxu3 %v1584_v47 }
 0x3b2   :  { %v709_v8 = vpop.f32.mrf.mxu0  ;;  %v722_v12 = vpop.f32.mrf.mxu1 }
 0x3b3   :  { %v752_v16 = vadd.f32 %v1129_v3, %v709_v8  ;;  %v753_v17 = vadd.f32 %v1130_v7, %v722_v12 }
 0x3b5   :  { %v756_v21 = vmul.f32 0.5, %v752_v16  ;;  %v760_v25 = vmul.f32 0.5, %v753_v17 }
 0x3b7   :  { %1227 = vtanh.f32 %v756_v21  ;;  %v985_v21 = vld [vmem:[%s1933_s0 + $0xe0] sm:$0xff] }
 0x3b8   :  { %1229 = vtanh.f32 %v760_v25  ;;  %v986_v25 = vld [vmem:[%s1933_s0 + $0xe8] sm:$0xff] }
 0x3b9   :  { %v735_v34 = vpop.f32.mrf.mxu2  ;;  %v748_v38 = vpop.f32.mrf.mxu3 }
 0x3ba   :  { %v754_v44 = vadd.f32 %v1131_v29, %v735_v34  ;;  %v755_v45 = vadd.f32 %v1132_v33, %v748_v38  ;;  %v711_v46 = vpop.f32.mrf.mxu0  ;;  %v724_v50 = vpop.f32.mrf.mxu1 }
 0x3bb   :  { %v987_v46 = vld [vmem:[%s1933_s0 + $0xf0] sm:$0xff]  ;;  %v988_v50 = vld [vmem:[%s1933_s0 + $0xf8] sm:$0xff]  ;;  %s1284_s0 = smov [#allocation4]  }
 0x3bc   :  { %1231 = vtanh.f32 %v754_v44  ;;  %v765_v56 = vmul.f32 0.5, %v755_v45  ;;  %s962_s30 = sshll.u32 %s1284_s0, 4  ;;  %s963_s30 = int_to_ptr.vmem [resolvable:$true] %s962_s30 }
 0x3bd   :  { %v1228_v57 = vpop.eup %1227 }
 0x3be   :  { %v1230_v58 = vpop.eup %1229  ;;  %v758_v62 = vmul.f32 0.5, %v1228_v57  ;;  %1233 = vtanh.f32 %v765_v56 }
 0x3bf   :  { %v762_v5 = vmul.f32 0.5, %v1230_v58 }
 0x3c0   :  { %v759_v10 = vadd.f32 0.5, %v758_v62 }
 0x3c1   :  { %v763_v11 = vadd.f32 0.5, %v762_v5  ;;  %v737_v18 = vpop.f32.mrf.mxu2  ;;  %v750_v24 = vpop.f32.mrf.mxu3 }
 0x3c2   :  { %v1232_v26 = vpop.eup %1231 }
 0x3c3   :  { %v769_v27 = vmul.f32 %v763_v11, %v1858_v1  ;;  %v770_v32 = vmul.f32 %v1232_v26, %v759_v10 }
 0x3c4   :  { %v1234_v41 = vpop.eup %1233 }
 0x3c5   :  { %v771_v42 = vadd.f32 %v770_v32, %v769_v27  ;;  %v767_v43 = vmul.f32 0.5, %v1234_v41 }
 0x3c7   :  { %1235 = vtanh.f32 %v771_v42  ;;  %v768_v47 = vadd.f32 0.5, %v767_v43 }
 0x3cd   :  { %v1236_v61 = vpop.eup %1235 }
 0x3ce   :  { %v773_v13 = vmul.f32 %v1236_v61, %v768_v47 }
 0x3d0   :  { %948 = vst [vmem:[#allocation4 + $0x28] sm:$0xff] %v773_v13  ;;  %v774_v14 = vpack.c.bf16 %v773_v13, %v773_v13 }
 0x3d2   :  { %787 = vmatmul.bf16.vlgmr.msra.gmra.mxu0 %v774_v14  ;;  %800 = vmatmul.bf16.vlgmr.msra.gmra.mxu1 %v774_v14 }
 0x3d3   :  { %813 = vmatmul.bf16.vlgmr.msra.gmra.mxu2 %v774_v14  ;;  %826 = vmatmul.bf16.vlgmr.msra.gmra.mxu3 %v774_v14 }
 0x44f   :  { %v788_v20 = vpop.f32.mrf.mxu0  ;;  %v801_v22 = vpop.f32.mrf.mxu1 }
 0x450   :  { %v831_v23 = vadd.f32 %v1121_v15, %v788_v20  ;;  %v832_v28 = vadd.f32 %v1122_v19, %v801_v22 }
 0x452   :  { %v835_v30 = vmul.f32 0.5, %v831_v23  ;;  %v839_v31 = vmul.f32 0.5, %v832_v28 }
 0x454   :  { %1237 = vtanh.f32 %v835_v30 }
 0x455   :  { %1239 = vtanh.f32 %v839_v31 }
 0x456   :  { %v814_v37 = vpop.f32.mrf.mxu2  ;;  %v827_v40 = vpop.f32.mrf.mxu3 }
 0x457   :  { %v833_v48 = vadd.f32 %v1123_v35, %v814_v37  ;;  %v834_v49 = vadd.f32 %v1124_v36, %v827_v40  ;;  %v790_v52 = vpop.f32.mrf.mxu0  ;;  %v803_v53 = vpop.f32.mrf.mxu1 }
 0x459   :  { %1241 = vtanh.f32 %v833_v48  ;;  %v844_v54 = vmul.f32 0.5, %v834_v49 }
 0x45a   :  { %v1238_v59 = vpop.eup %1237 }
 0x45b   :  { %v1240_v39 = vpop.eup %1239  ;;  %v837_v60 = vmul.f32 0.5, %v1238_v59  ;;  %1243 = vtanh.f32 %v844_v54 }
 0x45c   :  { %v841_v63 = vmul.f32 0.5, %v1240_v39 }
 0x45d   :  { %v838_v51 = vadd.f32 0.5, %v837_v60 }
 0x45e   :  { %v842_v0 = vadd.f32 0.5, %v841_v63  ;;  %v816_v1 = vpop.f32.mrf.mxu2  ;;  %v829_v2 = vpop.f32.mrf.mxu3 }
 0x45f   :  { %v1242_v55 = vpop.eup %1241 }
 0x460   :  { %v848_v4 = vmul.f32 %v842_v0, %v771_v42  ;;  %v849_v6 = vmul.f32 %v1242_v55, %v838_v51 }
 0x461   :  { %v1244_v9 = vpop.eup %1243 }
 0x462   :  { %v850_v3 = vadd.f32 %v849_v6, %v848_v4  ;;  %v846_v7 = vmul.f32 0.5, %v1244_v9 }
 0x464   :  { %1245 = vtanh.f32 %v850_v3  ;;  %v847_v8 = vadd.f32 0.5, %v846_v7 }
 0x46a   :  { %v1246_v12 = vpop.eup %1245 }
 0x46b   :  { %v852_v16 = vmul.f32 %v1246_v12, %v847_v8 }
 0x46d   :  { %949 = vst [vmem:[#allocation4 + $0x30] sm:$0xff] %v852_v16  ;;  %v853_v17 = vpack.c.bf16 %v852_v16, %v852_v16 }
 0x46f   :  { %866 = vmatmul.bf16.vlgmr.msrb.gmra.mxu0 %v853_v17  ;;  %879 = vmatmul.bf16.vlgmr.msrb.gmra.mxu1 %v853_v17 }
 0x470   :  { %892 = vmatmul.bf16.vlgmr.msrb.gmra.mxu2 %v853_v17  ;;  %905 = vmatmul.bf16.vlgmr.msrb.gmra.mxu3 %v853_v17 }
 0x4ec   :  { %v867_v29 = vpop.f32.mrf.mxu0  ;;  %v880_v33 = vpop.f32.mrf.mxu1 }
 0x4ed   :  { %v910_v34 = vadd.f32 %v985_v21, %v867_v29  ;;  %v911_v38 = vadd.f32 %v986_v25, %v880_v33 }
 0x4ef   :  { %v914_v44 = vmul.f32 0.5, %v910_v34  ;;  %v918_v45 = vmul.f32 0.5, %v911_v38 }
 0x4f1   :  { %1247 = vtanh.f32 %v914_v44 }
 0x4f2   :  { %1249 = vtanh.f32 %v918_v45 }
 0x4f3   :  { %v893_v56 = vpop.f32.mrf.mxu2  ;;  %v906_v57 = vpop.f32.mrf.mxu3 }
 0x4f4   :  { %v912_v58 = vadd.f32 %v987_v46, %v893_v56  ;;  %v913_v62 = vadd.f32 %v988_v50, %v906_v57  ;;  %v869_v5 = vpop.f32.mrf.mxu0  ;;  %v882_v10 = vpop.f32.mrf.mxu1 }
 0x4f6   :  { %1251 = vtanh.f32 %v912_v58  ;;  %v923_v11 = vmul.f32 0.5, %v913_v62 }
 0x4f7   :  { %v1248_v18 = vpop.eup %1247 }
 0x4f8   :  { %v1250_v24 = vpop.eup %1249  ;;  %v916_v26 = vmul.f32 0.5, %v1248_v18  ;;  %1253 = vtanh.f32 %v923_v11 }
 0x4f9   :  { %v920_v27 = vmul.f32 0.5, %v1250_v24 }
 0x4fa   :  { %v917_v32 = vadd.f32 0.5, %v916_v26 }
 0x4fb   :  { %v921_v41 = vadd.f32 0.5, %v920_v27  ;;  %v895_v42 = vpop.f32.mrf.mxu2  ;;  %v908_v43 = vpop.f32.mrf.mxu3 }
 0x4fc   :  { %v1252_v47 = vpop.eup %1251 }
 0x4fd   :  { %v927_v61 = vmul.f32 %v921_v41, %v850_v3  ;;  %v928_v13 = vmul.f32 %v1252_v47, %v917_v32 }
 0x4fe   :  { %v1254_v14 = vpop.eup %1253 }
 0x4ff   :  { %v929_v15 = vadd.f32 %v928_v13, %v927_v61  ;;  %v925_v19 = vmul.f32 0.5, %v1254_v14 }
 0x501   :  { %1255 = vtanh.f32 %v929_v15  ;;  %v926_v20 = vadd.f32 0.5, %v925_v19 }
 0x507   :  { %v1256_v22 = vpop.eup %1255 }
 0x508   :  { %v931_v23 = vmul.f32 %v1256_v22, %v926_v20 }
 0x50a   :  { %v932_v28 = vpack.c.bf16 %v931_v23, %v931_v23  ;;  %950 = vst [vmem:[#allocation4 + $0x38] sm:$0xff] %v931_v23 }
 0x50b   :  { %970 = dma.vmem_to_hbm [thread:$0]  %s963_s30, 1024, %s965_s5, [#allocation5], %s1285_s6, %s1285_s6, %s1286_s7  }
 0x50c   :  { %933 = vst [vmem:[#allocation2] sm:$0xf] %v932_v28 }
 0x50d   :  { %1281 = dma.done.wait [#allocation5], 1024  }
 0x50e   :  { %1282 = vsyncadd [#allocation5], 4294966272 }
 0x50f   :  { %975 = vsyncpa [#allocation5], 1 }

</bundles_post_ra>
